<compile_context>
chip_gen: v7x
topology: tpu7x:2x2x1
jax: 0.10.0
libtpu: 0.0.40
codegen_flags: <defaults>
</compile_context>

<pallas_src>
import jax
import jax.numpy as jnp
import numpy as np
from jax.experimental import pallas as pl
from jax.experimental.pallas import tpu as pltpu

# ----- model hyper-params (scaled-down versions of the module's 768/64/2) -----
HIDDEN = 32        # config.hidden_size
EMB_SIZE = 32      # emb_size
BLOCK_SIZE = 8     # block_size
NUM_CLASSES = 2    # config.num_labels (logit width)
TOPK_LABELS = 1    # self.num_labels (ATLoss.get_label top-k)
NUM_GROUPS = EMB_SIZE // BLOCK_SIZE
KDIM = EMB_SIZE * BLOCK_SIZE
LANES = 128        # logits / preds / labels lane-padded to the TPU lane width

B = 2              # batch (documents)
C = 16             # sequence length
H = 4              # attention heads
NUM_ENT = 4        # entities per doc

# The kernel hard-codes the top-1 shortcut of ATLoss.get_label (num_labels == 1
# in the reference module). Real top-k is not implemented.
assert TOPK_LABELS == 1, "kernel implements ATLoss.get_label only for num_labels == 1"


# =============================================================================
# Fused kernel: rs context, head/tail extractors, grouped bilinear, ATLoss,
#               ATLoss.get_label -- one grid step per tile of (batch-folded) pairs.
# =============================================================================
def docre_pair_kernel(ha_ref, ta_ref, doc_mask_ref, seq_ref, hs_ref, ts_ref,
                      labels_ref, th_ref,
                      wh_h_ref, wh_r_ref, bh_ref, wt_h_ref, wt_r_ref, bt_ref,
                      rep_h_ref, rep_t_ref, wb_ref, bb_ref,
                      preds_ref, loss_ref):
    f32, bf16 = jnp.float32, jnp.bfloat16
    hc = ha_ref.shape[1]                       # heads * seq_len (lane-folded)
    seq_len = hc // H                          # tokens per document

    # ---- rs: localized context embedding ------------------------------------
    # attention DMA'd in bf16 (halves the dominant HBM stream); product/means in
    # f32.  TODO(synk): on v6e/v7x (bf16 VPU) the product itself can stay bf16.
    prod = ha_ref[...].astype(f32) * ta_ref[...].astype(f32)       # [rows, H*C]
    # head mean = H lane-aligned slab adds on the VPU (no s_mat constant/matmul)
    ht = prod[:, 0:seq_len]
    for h in range(1, H):
        ht = ht + prod[:, h * seq_len:(h + 1) * seq_len]
    ht = ht * (1.0 / H)                                            # [rows, C]
    ht = ht / (jnp.sum(ht, axis=1, keepdims=True) + 1e-5)

    # block-diagonal selection of each row's own document (handles ragged
    # per-document pair counts; padded rows have an all-zero mask row).
    doc_mask = doc_mask_ref[...]                                   # [rows, B*C]
    n_docs = doc_mask.shape[1] // seq_len
    row_valid = (jnp.sum(doc_mask, axis=1, keepdims=True) > 0.0).astype(f32)
    ht_bd = jnp.concatenate([ht] * n_docs, axis=1) * doc_mask      # [rows, B*C]
    rs = jnp.dot(ht_bd.astype(bf16), seq_ref[...],                 # [rows, D]
                 preferred_element_type=f32)

    # ---- head/tail extractors: tanh([x|rs] @ W + b), W split in halves -------
    rs_b = rs.astype(bf16)
    zh = jnp.tanh(jnp.dot(hs_ref[...], wh_h_ref[...], preferred_element_type=f32)
                  + jnp.dot(rs_b, wh_r_ref[...], preferred_element_type=f32)
                  + bh_ref[...])                                   # [rows, E]
    zt = jnp.tanh(jnp.dot(ts_ref[...], wt_h_ref[...], preferred_element_type=f32)
                  + jnp.dot(rs_b, wt_r_ref[...], preferred_element_type=f32)
                  + bt_ref[...])                                   # [rows, E]

    # ---- grouped bilinear -> logits ------------------------------------------
    # bl[r, g*BK*BK + i*BK + j] = zh[r, g*BK+i] * zt[r, g*BK+j], built with two
    # constant 0/1 expansion matmuls (hoisted to the wrapper, bf16).
    # TODO(synk): at the real config (E=768, BK=64) replace the expansion with a
    # K-tiled contraction over wb (extra "arbitrary" grid axis + f32 VMEM
    # accumulator via pl.when) so neither bl nor the ExK constants materialize.
    bl = (jnp.dot(zh.astype(bf16), rep_h_ref[...], preferred_element_type=f32)
          * jnp.dot(zt.astype(bf16), rep_t_ref[...], preferred_element_type=f32))
    # bb pad lanes are pre-set to -1e30 in the wrapper -> pad-lane mask is free.
    logits = (jnp.dot(bl.astype(bf16), wb_ref[...], preferred_element_type=f32)
              + bb_ref[...])                                       # [rows, 128] f32

    # ---- ATLoss forward (all f32; loss1 finished before logit2 goes live) ----
    labels = labels_ref[...]                   # column 0 already zeroed in wrapper
    th = th_ref[...]                           # [1, 128], 1.0 at lane 0
    logit1 = logits - (1.0 - (labels + th)) * 1e30
    ls1 = logit1 - jnp.max(logit1, axis=1, keepdims=True)
    ls1 = ls1 - jnp.log(jnp.sum(jnp.exp(ls1), axis=1, keepdims=True))
    loss1 = -jnp.sum(ls1 * labels, axis=1, keepdims=True)          # [rows, 1]

    logit2 = logits - labels * 1e30            # (1 - n_mask) == labels
    ls2 = logit2 - jnp.max(logit2, axis=1, keepdims=True)
    ls2 = ls2 - jnp.log(jnp.sum(jnp.exp(ls2), axis=1, keepdims=True))
    loss2 = -jnp.sum(ls2 * th, axis=1, keepdims=True)              # [rows, 1]

    row_loss = (loss1 + loss2) * row_valid
    tile_loss = jnp.sum(row_loss, axis=0, keepdims=True)           # [1, 1]
    loss_ref[...] = jnp.zeros(loss_ref.shape, f32) + tile_loss     # tiny slab out

    # ---- ATLoss.get_label (num_labels == 1 -> top-1 == row max) --------------
    th_logit = logits[:, 0:1]
    top_v = jnp.max(logits, axis=1, keepdims=True)
    preds = jnp.where(jnp.logical_and(logits > th_logit, logits >= top_v), 1.0, 0.0)
    no_pos = (jnp.sum(preds, axis=1, keepdims=True) == 0.0).astype(f32)
    preds_ref[...] = preds * (1.0 - th) + th * no_pos              # lane-dense store


def docre_pairs_fused(ha, ta, doc_mask, seq2d, hs, ts, labels_pad, th_row,
                      wh_h, wh_r, bh, wt_h, wt_r, bt, rep_h, rep_t, wb_pad, bb_pad,
                      *, row_tile):
    rows_pad, hc = ha.shape
    bc, d = seq2d.shape
    e = wh_h.shape[1]
    k, lanes = wb_pad.shape
    ntiles = rows_pad // row_tile

    def row_spec(width):
        return pl.BlockSpec((row_tile, width), lambda t: (t, 0))

    # TODO(synk): at production scale mark the weight/constant specs with
    # pipeline_mode=pl.Buffered(1) so never-refetched blocks are not
    # double-buffered (halves weight residency against v7x's 64 MiB VMEM).
    def const_spec(shape):
        return pl.BlockSpec(shape, lambda t: (0, 0))

    return pl.pallas_call(
        docre_pair_kernel,
        out_shape=(jax.ShapeDtypeStruct((rows_pad, lanes), jnp.float32),
                   jax.ShapeDtypeStruct((ntiles, 8, lanes), jnp.float32)),
        grid=(ntiles,),
        in_specs=[
            row_spec(hc),                      # h_att  (bf16, heads folded on lanes)
            row_spec(hc),                      # t_att
            row_spec(bc),                      # doc_mask (f32 block-diag selector)
            const_spec((bc, d)),               # sequence_output (bf16, [B*C, D])
            row_spec(d),                       # hs (bf16)
            row_spec(d),                       # ts (bf16)
            row_spec(lanes),                   # labels (f32, lane-padded, col0=0)
            const_spec((1, lanes)),            # threshold-lane mask (col == 0)
            const_spec((d, e)),                # W_head[:D] (bf16)
            const_spec((d, e)),                # W_head[D:]
            const_spec((1, e)),                # b_head (f32)
            const_spec((d, e)),                # W_tail[:D]
            const_spec((d, e)),                # W_tail[D:]
            const_spec((1, e)),                # b_tail
            const_spec((e, k)),                # rep_h (bf16 0/1 expansion)
            const_spec((e, k)),                # rep_t
            const_spec((k, lanes)),            # W_bil (bf16, lane-padded)
            const_spec((1, lanes)),            # b_bil (f32, pad lanes = -1e30)
        ],
        out_specs=(row_spec(lanes),                                     # preds slab
                   pl.BlockSpec((None, 8, lanes), lambda t: (t, 0, 0))),  # loss sums
        compiler_params=pltpu.CompilerParams(
            dimension_semantics=("parallel",),        # row tiles across v7x TCs
            vmem_limit_bytes=64 * 1024 * 1024),
    )(ha, ta, doc_mask, seq2d, hs, ts, labels_pad, th_row,
      wh_h, wh_r, bh, wt_h, wt_r, bt, rep_h, rep_t, wb_pad, bb_pad)


# =============================================================================
# Entity gather (get_hrt minus rs, which the kernel fuses): host index tables +
# vectorized jnp gathers / segment reductions.
# =============================================================================
def get_hrt_host(sequence_output, attention, entity_pos, hts):
    # TODO(synk): at production scale move this into a PrefetchScalarGridSpec
    # Pallas kernel (mention/pair tables in SMEM + pl.ds / pl.Element row gathers).
    offset = 0  # matches the reference get_hrt
    hs_b, ts_b, ha_b, ta_b, doc_b = [], [], [], [], []
    for i in range(len(entity_pos)):
        starts, seg = [], []
        for e_idx, mentions in enumerate(entity_pos[i]):
            for (s, _) in mentions:
                starts.append(s + offset)
                seg.append(e_idx)
        n_e = len(entity_pos[i])
        starts = jnp.asarray(starts, dtype=jnp.int32)
        seg = jnp.asarray(seg, dtype=jnp.int32)

        m_emb = jnp.take(sequence_output[i], starts, axis=0)              # [M, D]
        m_att = jnp.moveaxis(jnp.take(attention[i], starts, axis=1), 1, 0)  # [M, H, C]

        # entity embedding: logsumexp over the entity's mentions
        seg_max = jax.ops.segment_max(m_emb, seg, num_segments=n_e)       # [n_e, D]
        seg_exp = jax.ops.segment_sum(jnp.exp(m_emb - seg_max[seg]), seg,
                                      num_segments=n_e)
        ent_emb = jnp.log(seg_exp) + seg_max
        # entity attention: mean over the entity's mentions
        att_sum = jax.ops.segment_sum(m_att, seg, num_segments=n_e)       # [n_e, H, C]
        cnt = jax.ops.segment_sum(jnp.ones_like(starts, dtype=jnp.float32), seg,
                                  num_segments=n_e)
        ent_att = att_sum / cnt[:, None, None]

        ht_i = jnp.asarray(hts[i], dtype=jnp.int32)                       # [R_i, 2]
        hs_b.append(jnp.take(ent_emb, ht_i[:, 0], axis=0))
        ts_b.append(jnp.take(ent_emb, ht_i[:, 1], axis=0))
        ha_b.append(jnp.take(ent_att, ht_i[:, 0], axis=0))
        ta_b.append(jnp.take(ent_att, ht_i[:, 1], axis=0))
        doc_b.append(np.full(len(hts[i]), i, dtype=np.int32))

    hs = jnp.concatenate(hs_b, axis=0)                                    # [N, D]
    ts = jnp.concatenate(ts_b, axis=0)
    h_att = jnp.concatenate(ha_b, axis=0)                                 # [N, H, C]
    t_att = jnp.concatenate(ta_b, axis=0)
    doc_id = np.concatenate(doc_b, axis=0)                                # [N] host
    return hs, ts, h_att, t_att, doc_id


def docre_forward(params, sequence_output, attention, entity_pos, hts, labels):
    f32, bf16 = jnp.float32, jnp.bfloat16
    hs, ts, h_att, t_att, doc_id = get_hrt_host(sequence_output, attention,
                                                entity_pos, hts)
    n_docs, seq_len, d = sequence_output.shape
    n_pairs = hs.shape[0]

    # pair-tile sizing: one tile at toy scale, 128-row tiles at scale (multiple
    # of 8; sized so double-buffered row tiles + single weights fit v7x VMEM).
    row_tile = min(((n_pairs + 7) // 8) * 8, 128)
    rows_pad = ((n_pairs + row_tile - 1) // row_tile) * row_tile
    pad = rows_pad - n_pairs

    def pad_rows(x):
        return jnp.pad(x, ((0, pad),) + ((0, 0),) * (x.ndim - 1))

    # lane-dense / bf16 layouts (wrapper-side layout plumbing only)
    ha_f = pad_rows(h_att.reshape(n_pairs, H * seq_len)).astype(bf16)
    ta_f = pad_rows(t_att.reshape(n_pairs, H * seq_len)).astype(bf16)
    hs_p = pad_rows(hs).astype(bf16)
    ts_p = pad_rows(ts).astype(bf16)
    seq2d = sequence_output.reshape(n_docs * seq_len, d).astype(bf16)

    labels0 = labels.astype(f32).at[:, 0].set(0.0)        # ATLoss zeroes column 0
    labels_p = pad_rows(jnp.pad(labels0, ((0, 0), (0, LANES - NUM_CLASSES))))

    # ---- constants hoisted out of the kernel (built once, not per grid step) --
    doc_pad = np.concatenate([np.asarray(doc_id, np.int32),
                              np.full(pad, -1, np.int32)])
    col_doc = np.arange(n_docs * seq_len, dtype=np.int32) // seq_len
    doc_mask = jnp.asarray((doc_pad[:, None] == col_doc[None, :]).astype(np.float32))
    th_row = jnp.zeros((1, LANES), f32).at[0, 0].set(1.0)

    kk = np.arange(KDIM)
    ee = np.arange(EMB_SIZE)[:, None]
    rep_h = jnp.asarray((ee == (kk // BLOCK_SIZE)[None, :])
                        .astype(np.float32)).astype(bf16)
    rep_t = jnp.asarray(
        (ee == ((kk // (BLOCK_SIZE * BLOCK_SIZE)) * BLOCK_SIZE + kk % BLOCK_SIZE)[None, :]
         ).astype(np.float32)).astype(bf16)

    wb_pad = jnp.pad(params["w_bil"], ((0, 0), (0, LANES - NUM_CLASSES))).astype(bf16)
    # fold the pad-lane logit mask into the bilinear bias (pad lanes -> -1e30)
    bb_pad = jnp.pad(params["b_bil"], ((0, 0), (0, LANES - NUM_CLASSES)),
                     constant_values=-1e30).astype(f32)
    wh, wt = params["w_head"], params["w_tail"]

    preds_slab, loss_part = docre_pairs_fused(
        ha_f, ta_f, doc_mask, seq2d, hs_p, ts_p, labels_p, th_row,
        wh[:d].astype(bf16), wh[d:].astype(bf16), params["b_head"].astype(f32),
        wt[:d].astype(bf16), wt[d:].astype(bf16), params["b_tail"].astype(f32),
        rep_h, rep_t, wb_pad, bb_pad, row_tile=row_tile)

    preds = preds_slab[:n_pairs, :NUM_CLASSES]                     # get_label output
    loss = jnp.sum(loss_part[:, 0, 0]) / n_pairs                   # ATLoss mean
    return loss, preds


# =============================================================================
# Pure-JAX reference of the same forward (correctness check only).  Mirrors the
# kernel's bf16-operand / f32-accumulate matmul rounding; everything else f32.
# =============================================================================
def ref_forward(params, seq, doc_id, h_att, t_att, hs, ts, labels):
    f32, bf16 = jnp.float32, jnp.bfloat16
    d = seq.shape[-1]

    def bdot(a, b):
        return jnp.dot(a.astype(bf16), b.astype(bf16), preferred_element_type=f32)

    ha = h_att.astype(bf16).astype(f32)      # attention arrives in bf16
    ta = t_att.astype(bf16).astype(f32)
    ht = (ha * ta).mean(axis=1)                                    # [N, C]
    ht = ht / (ht.sum(axis=-1, keepdims=True) + 1e-5)
    seq_rows = seq[jnp.asarray(doc_id)]                            # [N, C, D]
    rs = jnp.einsum("nc,ncd->nd", ht.astype(bf16), seq_rows.astype(bf16),
                    preferred_element_type=f32)

    wh, wt = params["w_head"], params["w_tail"]
    zh = jnp.tanh(bdot(hs, wh[:d]) + bdot(rs, wh[d:]) + params["b_head"])
    zt = jnp.tanh(bdot(ts, wt[:d]) + bdot(rs, wt[d:]) + params["b_tail"])
    n = zh.shape[0]
    zh_q = zh.astype(bf16).astype(f32)
    zt_q = zt.astype(bf16).astype(f32)
    bl = (zh_q.reshape(n, NUM_GROUPS, BLOCK_SIZE, 1)
          * zt_q.reshape(n, NUM_GROUPS, 1, BLOCK_SIZE)).reshape(n, KDIM)
    logits = bdot(bl, params["w_bil"]) + params["b_bil"]

    # ATLoss.forward
    lab = labels.astype(f32).at[:, 0].set(0.0)
    th_label = jnp.zeros_like(lab).at[:, 0].set(1.0)
    loss1 = -(jax.nn.log_softmax(logits - (1.0 - (lab + th_label)) * 1e30, axis=-1)
              * lab).sum(1)
    loss2 = -(jax.nn.log_softmax(logits - lab * 1e30, axis=-1) * th_label).sum(1)
    loss = (loss1 + loss2).mean()

    # ATLoss.get_label(num_labels=1)
    th_logit = logits[:, 0:1]
    top_v = jnp.max(logits, axis=1, keepdims=True)
    mask = (logits > th_logit) & (logits >= top_v)
    preds = jnp.where(mask, 1.0, 0.0)
    preds = preds.at[:, 0].set((preds.sum(1) == 0.0).astype(f32))
    return loss, preds


# =============================================================================
# main
# =============================================================================
if __name__ == "__main__":
    key = jax.random.PRNGKey(0)
    ks = jax.random.split(key, 10)

    # synthetic encoder outputs (stand-in for process_long_input / SciBERT)
    sequence_output = jax.random.normal(ks[0], (B, C, HIDDEN), dtype=jnp.float32)
    attention = jax.nn.softmax(
        jax.random.normal(ks[1], (B, H, C, C), dtype=jnp.float32), axis=-1)

    # deterministic parameters (stored [in, out]; y = x @ W + b == torch Linear)
    params = {
        "w_head": 0.1 * jax.random.normal(ks[2], (2 * HIDDEN, EMB_SIZE), jnp.float32),
        "b_head": 0.1 * jax.random.normal(ks[3], (1, EMB_SIZE), jnp.float32),
        "w_tail": 0.1 * jax.random.normal(ks[4], (2 * HIDDEN, EMB_SIZE), jnp.float32),
        "b_tail": 0.1 * jax.random.normal(ks[5], (1, EMB_SIZE), jnp.float32),
        "w_bil": 0.1 * jax.random.normal(ks[6], (KDIM, NUM_CLASSES), jnp.float32),
        "b_bil": 0.1 * jax.random.normal(ks[7], (1, NUM_CLASSES), jnp.float32),
    }

    # entity mentions: list (per doc) of list (per entity) of (start, end) spans
    entity_pos = [
        [[(0, 1)], [(2, 3), (5, 6)], [(8, 9)], [(10, 11), (12, 13)]],
        [[(1, 2)], [(3, 4)], [(6, 7), (9, 10)], [(13, 14)]],
    ]
    # head/tail pairs: all ordered entity pairs (i != j) -> 12 per doc
    pairs = [(i, j) for i in range(NUM_ENT) for j in range(NUM_ENT) if i != j]
    hts = [pairs, pairs]
    n_pairs = sum(len(p) for p in hts)                             # 24

    pos = jax.random.bernoulli(ks[8], 0.3, (n_pairs, 1)).astype(jnp.float32)
    labels = jnp.concatenate([1.0 - pos, pos], axis=1)             # [N, 2]

    loss, preds = docre_forward(params, sequence_output, attention,
                                entity_pos, hts, labels)
    jax.block_until_ready((loss, preds))

    # pure-JAX reference check (same bf16-matmul rounding as the kernel)
    hs_r, ts_r, ha_r, ta_r, doc_r = get_hrt_host(sequence_output, attention,
                                                 entity_pos, hts)
    ref_loss, ref_preds = ref_forward(params, sequence_output, doc_r,
                                      ha_r, ta_r, hs_r, ts_r, labels)
    np.testing.assert_allclose(float(loss), float(ref_loss), rtol=2e-3, atol=2e-4)
    np.testing.assert_array_equal(np.asarray(preds), np.asarray(ref_preds))

    assert preds.shape == (n_pairs, NUM_CLASSES)
    assert bool(jnp.isfinite(loss))
    print("KERNEL_OK")
</pallas_src>

<mosaic_0001>
module attributes {stable_mosaic.version = 11 : i64} {
  func.func @docre_pair_kernel(%arg0: i32, %arg1: memref<24x64xbf16, #tpu.memory_space<vmem>>, %arg2: memref<24x64xbf16, #tpu.memory_space<vmem>>, %arg3: memref<24x32xf32, #tpu.memory_space<vmem>>, %arg4: memref<32x32xbf16, #tpu.memory_space<vmem>>, %arg5: memref<24x32xbf16, #tpu.memory_space<vmem>>, %arg6: memref<24x32xbf16, #tpu.memory_space<vmem>>, %arg7: memref<24x128xf32, #tpu.memory_space<vmem>>, %arg8: memref<1x128xf32, #tpu.memory_space<vmem>>, %arg9: memref<32x32xbf16, #tpu.memory_space<vmem>>, %arg10: memref<32x32xbf16, #tpu.memory_space<vmem>>, %arg11: memref<1x32xf32, #tpu.memory_space<vmem>>, %arg12: memref<32x32xbf16, #tpu.memory_space<vmem>>, %arg13: memref<32x32xbf16, #tpu.memory_space<vmem>>, %arg14: memref<1x32xf32, #tpu.memory_space<vmem>>, %arg15: memref<32x256xbf16, #tpu.memory_space<vmem>>, %arg16: memref<32x256xbf16, #tpu.memory_space<vmem>>, %arg17: memref<256x128xbf16, #tpu.memory_space<vmem>>, %arg18: memref<1x128xf32, #tpu.memory_space<vmem>>, %arg19: memref<24x128xf32, #tpu.memory_space<vmem>>, %arg20: memref<1x8x128xf32, #tpu.memory_space<vmem>>) attributes {dimension_semantics = [#tpu.dimension_semantics<parallel>], iteration_bounds = array<i64: 1>, scalar_prefetch = 0 : i64, scratch_operands = 0 : i64, tpu.core_type = #tpu.core_type<tc>, window_params = [{transform_indices = @transform_0, window_bounds = array<i64: 24, 64>}, {transform_indices = @transform_1, window_bounds = array<i64: 24, 64>}, {transform_indices = @transform_2, window_bounds = array<i64: 24, 32>}, {pipeline_mode = #tpu.pipeline_mode<synchronous>, transform_indices = @transform_3, window_bounds = array<i64: 32, 32>}, {transform_indices = @transform_4, window_bounds = array<i64: 24, 32>}, {transform_indices = @transform_5, window_bounds = array<i64: 24, 32>}, {transform_indices = @transform_6, window_bounds = array<i64: 24, 128>}, {pipeline_mode = #tpu.pipeline_mode<synchronous>, transform_indices = @transform_7, window_bounds = array<i64: 1, 128>}, {pipeline_mode = #tpu.pipeline_mode<synchronous>, transform_indices = @transform_8, window_bounds = array<i64: 32, 32>}, {pipeline_mode = #tpu.pipeline_mode<synchronous>, transform_indices = @transform_9, window_bounds = array<i64: 32, 32>}, {pipeline_mode = #tpu.pipeline_mode<synchronous>, transform_indices = @transform_10, window_bounds = array<i64: 1, 32>}, {pipeline_mode = #tpu.pipeline_mode<synchronous>, transform_indices = @transform_11, window_bounds = array<i64: 32, 32>}, {pipeline_mode = #tpu.pipeline_mode<synchronous>, transform_indices = @transform_12, window_bounds = array<i64: 32, 32>}, {pipeline_mode = #tpu.pipeline_mode<synchronous>, transform_indices = @transform_13, window_bounds = array<i64: 1, 32>}, {pipeline_mode = #tpu.pipeline_mode<synchronous>, transform_indices = @transform_14, window_bounds = array<i64: 32, 256>}, {pipeline_mode = #tpu.pipeline_mode<synchronous>, transform_indices = @transform_15, window_bounds = array<i64: 32, 256>}, {pipeline_mode = #tpu.pipeline_mode<synchronous>, transform_indices = @transform_16, window_bounds = array<i64: 256, 128>}, {pipeline_mode = #tpu.pipeline_mode<synchronous>, transform_indices = @transform_17, window_bounds = array<i64: 1, 128>}, {transform_indices = @transform_18, window_bounds = array<i64: 24, 128>}, {transform_indices = @transform_19, window_bounds = array<i64: 1, 8, 128>}]} {
    %c0 = arith.constant 0 : index
    %c0_0 = arith.constant 0 : index
    %0 = vector.load %arg1[%c0, %c0_0] : memref<24x64xbf16, #tpu.memory_space<vmem>>, vector<24x64xbf16>
    %1 = arith.extf %0 : vector<24x64xbf16> to vector<24x64xf32>
    %c0_1 = arith.constant 0 : index
    %c0_2 = arith.constant 0 : index
    %2 = vector.load %arg2[%c0_1, %c0_2] : memref<24x64xbf16, #tpu.memory_space<vmem>>, vector<24x64xbf16>
    %3 = arith.extf %2 : vector<24x64xbf16> to vector<24x64xf32>
    %4 = arith.mulf %1, %3 : vector<24x64xf32>
    %5 = vector.extract_strided_slice %4 {offsets = [0, 0], sizes = [24, 16], strides = [1, 1]} : vector<24x64xf32> to vector<24x16xf32>
    %6 = vector.extract_strided_slice %4 {offsets = [0, 16], sizes = [24, 16], strides = [1, 1]} : vector<24x64xf32> to vector<24x16xf32>
    %7 = arith.addf %5, %6 : vector<24x16xf32>
    %8 = vector.extract_strided_slice %4 {offsets = [0, 32], sizes = [24, 16], strides = [1, 1]} : vector<24x64xf32> to vector<24x16xf32>
    %9 = arith.addf %7, %8 : vector<24x16xf32>
    %10 = vector.extract_strided_slice %4 {offsets = [0, 48], sizes = [24, 16], strides = [1, 1]} : vector<24x64xf32> to vector<24x16xf32>
    %11 = arith.addf %9, %10 : vector<24x16xf32>
    %cst = arith.constant 2.500000e-01 : f32
    %12 = vector.broadcast %cst : f32 to vector<24x16xf32>
    %13 = arith.mulf %11, %12 : vector<24x16xf32>
    %cst_3 = arith.constant dense<0.000000e+00> : vector<24xf32>
    %14 = vector.multi_reduction <add>, %13, %cst_3 [1] : vector<24x16xf32> to vector<24xf32>
    %15 = vector.shape_cast %14 : vector<24xf32> to vector<24x1xf32>
    %cst_4 = arith.constant 9.99999974E-6 : f32
    %16 = vector.broadcast %cst_4 : f32 to vector<24x1xf32>
    %17 = arith.addf %15, %16 : vector<24x1xf32>
    %18 = vector.broadcast %17 : vector<24x1xf32> to vector<24x16xf32>
    %19 = arith.divf %13, %18 : vector<24x16xf32>
    %c0_5 = arith.constant 0 : index
    %c0_6 = arith.constant 0 : index
    %20 = vector.load %arg3[%c0_5, %c0_6] : memref<24x32xf32, #tpu.memory_space<vmem>>, vector<24x32xf32>
    %cst_7 = arith.constant dense<0.000000e+00> : vector<24xf32>
    %21 = vector.multi_reduction <add>, %20, %cst_7 [1] : vector<24x32xf32> to vector<24xf32>
    %22 = vector.shape_cast %21 : vector<24xf32> to vector<24x1xf32>
    %cst_8 = arith.constant 0.000000e+00 : f32
    %23 = vector.broadcast %cst_8 : f32 to vector<24x1xf32>
    %24 = arith.cmpf ogt, %22, %23 : vector<24x1xf32>
    %25 = arith.extui %24 : vector<24x1xi1> to vector<24x1xi32>
    %26 = arith.sitofp %25 : vector<24x1xi32> to vector<24x1xf32>
    %27 = tpu.concatenate %19, %19 in 1 : vector<24x16xf32>, vector<24x16xf32> -> vector<24x32xf32>
    %28 = arith.mulf %27, %20 : vector<24x32xf32>
    %29 = arith.truncf %28 : vector<24x32xf32> to vector<24x32xbf16>
    %c0_9 = arith.constant 0 : index
    %c0_10 = arith.constant 0 : index
    %30 = vector.load %arg4[%c0_9, %c0_10] : memref<32x32xbf16, #tpu.memory_space<vmem>>, vector<32x32xbf16>
    %cst_11 = arith.constant dense<0.000000e+00> : vector<24x32xf32>
    %31 = tpu.matmul %29, %30, %cst_11 {dimension_numbers = #tpu.dot_dimension_numbers<[1], [0], [0], [1], [0, 0, 1, 1], [], []>} : vector<24x32xbf16>, vector<32x32xbf16>, vector<24x32xf32> -> vector<24x32xf32>
    %32 = arith.truncf %31 : vector<24x32xf32> to vector<24x32xbf16>
    %c0_12 = arith.constant 0 : index
    %c0_13 = arith.constant 0 : index
    %33 = vector.load %arg5[%c0_12, %c0_13] : memref<24x32xbf16, #tpu.memory_space<vmem>>, vector<24x32xbf16>
    %c0_14 = arith.constant 0 : index
    %c0_15 = arith.constant 0 : index
    %34 = vector.load %arg9[%c0_14, %c0_15] : memref<32x32xbf16, #tpu.memory_space<vmem>>, vector<32x32xbf16>
    %cst_16 = arith.constant dense<0.000000e+00> : vector<24x32xf32>
    %35 = tpu.matmul %33, %34, %cst_16 {dimension_numbers = #tpu.dot_dimension_numbers<[1], [0], [0], [1], [0, 0, 1, 1], [], []>} : vector<24x32xbf16>, vector<32x32xbf16>, vector<24x32xf32> -> vector<24x32xf32>
    %c0_17 = arith.constant 0 : index
    %c0_18 = arith.constant 0 : index
    %36 = vector.load %arg10[%c0_17, %c0_18] : memref<32x32xbf16, #tpu.memory_space<vmem>>, vector<32x32xbf16>
    %cst_19 = arith.constant dense<0.000000e+00> : vector<24x32xf32>
    %37 = tpu.matmul %32, %36, %cst_19 {dimension_numbers = #tpu.dot_dimension_numbers<[1], [0], [0], [1], [0, 0, 1, 1], [], []>} : vector<24x32xbf16>, vector<32x32xbf16>, vector<24x32xf32> -> vector<24x32xf32>
    %38 = arith.addf %35, %37 : vector<24x32xf32>
    %c0_20 = arith.constant 0 : index
    %c0_21 = arith.constant 0 : index
    %39 = vector.load %arg11[%c0_20, %c0_21] : memref<1x32xf32, #tpu.memory_space<vmem>>, vector<1x32xf32>
    %40 = vector.broadcast %39 : vector<1x32xf32> to vector<24x32xf32>
    %41 = arith.addf %38, %40 : vector<24x32xf32>
    %42 = math.tanh %41 : vector<24x32xf32>
    %c0_22 = arith.constant 0 : index
    %c0_23 = arith.constant 0 : index
    %43 = vector.load %arg6[%c0_22, %c0_23] : memref<24x32xbf16, #tpu.memory_space<vmem>>, vector<24x32xbf16>
    %c0_24 = arith.constant 0 : index
    %c0_25 = arith.constant 0 : index
    %44 = vector.load %arg12[%c0_24, %c0_25] : memref<32x32xbf16, #tpu.memory_space<vmem>>, vector<32x32xbf16>
    %cst_26 = arith.constant dense<0.000000e+00> : vector<24x32xf32>
    %45 = tpu.matmul %43, %44, %cst_26 {dimension_numbers = #tpu.dot_dimension_numbers<[1], [0], [0], [1], [0, 0, 1, 1], [], []>} : vector<24x32xbf16>, vector<32x32xbf16>, vector<24x32xf32> -> vector<24x32xf32>
    %c0_27 = arith.constant 0 : index
    %c0_28 = arith.constant 0 : index
    %46 = vector.load %arg13[%c0_27, %c0_28] : memref<32x32xbf16, #tpu.memory_space<vmem>>, vector<32x32xbf16>
    %cst_29 = arith.constant dense<0.000000e+00> : vector<24x32xf32>
    %47 = tpu.matmul %32, %46, %cst_29 {dimension_numbers = #tpu.dot_dimension_numbers<[1], [0], [0], [1], [0, 0, 1, 1], [], []>} : vector<24x32xbf16>, vector<32x32xbf16>, vector<24x32xf32> -> vector<24x32xf32>
    %48 = arith.addf %45, %47 : vector<24x32xf32>
    %c0_30 = arith.constant 0 : index
    %c0_31 = arith.constant 0 : index
    %49 = vector.load %arg14[%c0_30, %c0_31] : memref<1x32xf32, #tpu.memory_space<vmem>>, vector<1x32xf32>
    %50 = vector.broadcast %49 : vector<1x32xf32> to vector<24x32xf32>
    %51 = arith.addf %48, %50 : vector<24x32xf32>
    %52 = math.tanh %51 : vector<24x32xf32>
    %53 = arith.truncf %42 : vector<24x32xf32> to vector<24x32xbf16>
    %c0_32 = arith.constant 0 : index
    %c0_33 = arith.constant 0 : index
    %54 = vector.load %arg15[%c0_32, %c0_33] : memref<32x256xbf16, #tpu.memory_space<vmem>>, vector<32x256xbf16>
    %cst_34 = arith.constant dense<0.000000e+00> : vector<24x256xf32>
    %55 = tpu.matmul %53, %54, %cst_34 {dimension_numbers = #tpu.dot_dimension_numbers<[1], [0], [0], [1], [0, 0, 1, 1], [], []>} : vector<24x32xbf16>, vector<32x256xbf16>, vector<24x256xf32> -> vector<24x256xf32>
    %56 = arith.truncf %52 : vector<24x32xf32> to vector<24x32xbf16>
    %c0_35 = arith.constant 0 : index
    %c0_36 = arith.constant 0 : index
    %57 = vector.load %arg16[%c0_35, %c0_36] : memref<32x256xbf16, #tpu.memory_space<vmem>>, vector<32x256xbf16>
    %cst_37 = arith.constant dense<0.000000e+00> : vector<24x256xf32>
    %58 = tpu.matmul %56, %57, %cst_37 {dimension_numbers = #tpu.dot_dimension_numbers<[1], [0], [0], [1], [0, 0, 1, 1], [], []>} : vector<24x32xbf16>, vector<32x256xbf16>, vector<24x256xf32> -> vector<24x256xf32>
    %59 = arith.mulf %55, %58 : vector<24x256xf32>
    %60 = arith.truncf %59 : vector<24x256xf32> to vector<24x256xbf16>
    %c0_38 = arith.constant 0 : index
    %c0_39 = arith.constant 0 : index
    %61 = vector.load %arg17[%c0_38, %c0_39] : memref<256x128xbf16, #tpu.memory_space<vmem>>, vector<256x128xbf16>
    %cst_40 = arith.constant dense<0.000000e+00> : vector<24x128xf32>
    %62 = tpu.matmul %60, %61, %cst_40 {dimension_numbers = #tpu.dot_dimension_numbers<[1], [0], [0], [1], [0, 0, 1, 1], [], []>} : vector<24x256xbf16>, vector<256x128xbf16>, vector<24x128xf32> -> vector<24x128xf32>
    %c0_41 = arith.constant 0 : index
    %c0_42 = arith.constant 0 : index
    %63 = vector.load %arg18[%c0_41, %c0_42] : memref<1x128xf32, #tpu.memory_space<vmem>>, vector<1x128xf32>
    %64 = vector.broadcast %63 : vector<1x128xf32> to vector<24x128xf32>
    %65 = arith.addf %62, %64 : vector<24x128xf32>
    %c0_43 = arith.constant 0 : index
    %c0_44 = arith.constant 0 : index
    %66 = vector.load %arg7[%c0_43, %c0_44] : memref<24x128xf32, #tpu.memory_space<vmem>>, vector<24x128xf32>
    %c0_45 = arith.constant 0 : index
    %c0_46 = arith.constant 0 : index
    %67 = vector.load %arg8[%c0_45, %c0_46] : memref<1x128xf32, #tpu.memory_space<vmem>>, vector<1x128xf32>
    %68 = vector.broadcast %67 : vector<1x128xf32> to vector<24x128xf32>
    %69 = arith.addf %66, %68 : vector<24x128xf32>
    %cst_47 = arith.constant 1.000000e+00 : f32
    %70 = vector.broadcast %cst_47 : f32 to vector<24x128xf32>
    %71 = arith.subf %70, %69 : vector<24x128xf32>
    %cst_48 = arith.constant 1.000000e+30 : f32
    %72 = vector.broadcast %cst_48 : f32 to vector<24x128xf32>
    %73 = arith.mulf %71, %72 : vector<24x128xf32>
    %74 = arith.subf %65, %73 : vector<24x128xf32>
    %cst_49 = arith.constant dense<0xFF800000> : vector<24xf32>
    %75 = vector.multi_reduction <maximumf>, %74, %cst_49 [1] : vector<24x128xf32> to vector<24xf32>
    %76 = vector.shape_cast %75 : vector<24xf32> to vector<24x1xf32>
    %77 = vector.broadcast %76 : vector<24x1xf32> to vector<24x128xf32>
    %78 = arith.subf %74, %77 : vector<24x128xf32>
    %79 = math.exp %78 : vector<24x128xf32>
    %cst_50 = arith.constant dense<0.000000e+00> : vector<24xf32>
    %80 = vector.multi_reduction <add>, %79, %cst_50 [1] : vector<24x128xf32> to vector<24xf32>
    %81 = vector.shape_cast %80 : vector<24xf32> to vector<24x1xf32>
    %82 = math.log %81 : vector<24x1xf32>
    %83 = vector.broadcast %82 : vector<24x1xf32> to vector<24x128xf32>
    %84 = arith.subf %78, %83 : vector<24x128xf32>
    %85 = arith.mulf %84, %66 : vector<24x128xf32>
    %cst_51 = arith.constant dense<0.000000e+00> : vector<24xf32>
    %86 = vector.multi_reduction <add>, %85, %cst_51 [1] : vector<24x128xf32> to vector<24xf32>
    %87 = vector.shape_cast %86 : vector<24xf32> to vector<24x1xf32>
    %cst_52 = arith.constant 0.000000e+00 : f32
    %88 = vector.broadcast %cst_52 : f32 to vector<24x1xf32>
    %89 = arith.subf %88, %87 : vector<24x1xf32>
    %cst_53 = arith.constant 1.000000e+30 : f32
    %90 = vector.broadcast %cst_53 : f32 to vector<24x128xf32>
    %91 = arith.mulf %66, %90 : vector<24x128xf32>
    %92 = arith.subf %65, %91 : vector<24x128xf32>
    %cst_54 = arith.constant dense<0xFF800000> : vector<24xf32>
    %93 = vector.multi_reduction <maximumf>, %92, %cst_54 [1] : vector<24x128xf32> to vector<24xf32>
    %94 = vector.shape_cast %93 : vector<24xf32> to vector<24x1xf32>
    %95 = vector.broadcast %94 : vector<24x1xf32> to vector<24x128xf32>
    %96 = arith.subf %92, %95 : vector<24x128xf32>
    %97 = math.exp %96 : vector<24x128xf32>
    %cst_55 = arith.constant dense<0.000000e+00> : vector<24xf32>
    %98 = vector.multi_reduction <add>, %97, %cst_55 [1] : vector<24x128xf32> to vector<24xf32>
    %99 = vector.shape_cast %98 : vector<24xf32> to vector<24x1xf32>
    %100 = math.log %99 : vector<24x1xf32>
    %101 = vector.broadcast %100 : vector<24x1xf32> to vector<24x128xf32>
    %102 = arith.subf %96, %101 : vector<24x128xf32>
    %103 = vector.broadcast %67 : vector<1x128xf32> to vector<24x128xf32>
    %104 = arith.mulf %102, %103 : vector<24x128xf32>
    %cst_56 = arith.constant dense<0.000000e+00> : vector<24xf32>
    %105 = vector.multi_reduction <add>, %104, %cst_56 [1] : vector<24x128xf32> to vector<24xf32>
    %106 = vector.shape_cast %105 : vector<24xf32> to vector<24x1xf32>
    %cst_57 = arith.constant 0.000000e+00 : f32
    %107 = vector.broadcast %cst_57 : f32 to vector<24x1xf32>
    %108 = arith.subf %107, %106 : vector<24x1xf32>
    %109 = arith.addf %89, %108 : vector<24x1xf32>
    %110 = arith.mulf %109, %26 : vector<24x1xf32>
    %cst_58 = arith.constant dense<0.000000e+00> : vector<1xf32>
    %111 = vector.multi_reduction <add>, %110, %cst_58 [0] : vector<24x1xf32> to vector<1xf32>
    %112 = vector.shape_cast %111 : vector<1xf32> to vector<1x1xf32>
    %cst_59 = arith.constant 0.000000e+00 : f32
    %113 = vector.broadcast %cst_59 : f32 to vector<8x128xf32>
    %114 = vector.broadcast %112 : vector<1x1xf32> to vector<8x128xf32>
    %115 = arith.addf %113, %114 : vector<8x128xf32>
    %c0_60 = arith.constant 0 : index
    %c0_61 = arith.constant 0 : index
    %c0_62 = arith.constant 0 : index
    %116 = vector.load %arg20[%c0_60, %c0_61, %c0_62] : memref<1x8x128xf32, #tpu.memory_space<vmem>>, vector<1x8x128xf32>
    %117 = vector.shape_cast %116 : vector<1x8x128xf32> to vector<8x128xf32>
    %118 = vector.shape_cast %115 : vector<8x128xf32> to vector<1x8x128xf32>
    tpu.vector_store %arg20[%c0_60, %c0_61, %c0_62], %118 {strides = array<i32>} : memref<1x8x128xf32, #tpu.memory_space<vmem>>, vector<1x8x128xf32>,
    %119 = vector.extract_strided_slice %65 {offsets = [0, 0], sizes = [24, 1], strides = [1, 1]} : vector<24x128xf32> to vector<24x1xf32>
    %cst_63 = arith.constant dense<0xFF800000> : vector<24xf32>
    %120 = vector.multi_reduction <maximumf>, %65, %cst_63 [1] : vector<24x128xf32> to vector<24xf32>
    %121 = vector.shape_cast %120 : vector<24xf32> to vector<24x1xf32>
    %122 = vector.broadcast %119 : vector<24x1xf32> to vector<24x128xf32>
    %123 = arith.cmpf ogt, %65, %122 : vector<24x128xf32>
    %124 = vector.broadcast %121 : vector<24x1xf32> to vector<24x128xf32>
    %125 = arith.cmpf oge, %65, %124 : vector<24x128xf32>
    %126 = arith.andi %123, %125 : vector<24x128xi1>
    %cst_64 = arith.constant 1.000000e+00 : f32
    %cst_65 = arith.constant 0.000000e+00 : f32
    %127 = vector.broadcast %cst_64 : f32 to vector<24x128xf32>
    %128 = vector.broadcast %cst_65 : f32 to vector<24x128xf32>
    %129 = arith.select %126, %127, %128 : vector<24x128xi1>, vector<24x128xf32>
    %cst_66 = arith.constant dense<0.000000e+00> : vector<24xf32>
    %130 = vector.multi_reduction <add>, %129, %cst_66 [1] : vector<24x128xf32> to vector<24xf32>
    %131 = vector.shape_cast %130 : vector<24xf32> to vector<24x1xf32>
    %cst_67 = arith.constant 0.000000e+00 : f32
    %132 = vector.broadcast %cst_67 : f32 to vector<24x1xf32>
    %133 = arith.cmpf oeq, %131, %132 : vector<24x1xf32>
    %134 = arith.extui %133 : vector<24x1xi1> to vector<24x1xi32>
    %135 = arith.sitofp %134 : vector<24x1xi32> to vector<24x1xf32>
    %cst_68 = arith.constant 1.000000e+00 : f32
    %136 = vector.broadcast %cst_68 : f32 to vector<1x128xf32>
    %137 = arith.subf %136, %67 : vector<1x128xf32>
    %138 = vector.broadcast %137 : vector<1x128xf32> to vector<24x128xf32>
    %139 = arith.mulf %129, %138 : vector<24x128xf32>
    %140 = vector.broadcast %67 : vector<1x128xf32> to vector<24x128xf32>
    %141 = vector.broadcast %135 : vector<24x1xf32> to vector<24x128xf32>
    %142 = arith.mulf %140, %141 : vector<24x128xf32>
    %143 = arith.addf %139, %142 : vector<24x128xf32>
    %c0_69 = arith.constant 0 : index
    %c0_70 = arith.constant 0 : index
    %144 = vector.load %arg19[%c0_69, %c0_70] : memref<24x128xf32, #tpu.memory_space<vmem>>, vector<24x128xf32>
    tpu.vector_store %arg19[%c0_69, %c0_70], %143 {strides = array<i32>} : memref<24x128xf32, #tpu.memory_space<vmem>>, vector<24x128xf32>,
    return
  }
  func.func @transform_0(%arg0: i32) -> (i32, i32) {
    %c0_i32 = arith.constant 0 : i32
    %c0_i32_0 = arith.constant 0 : i32
    return %arg0, %c0_i32 : i32, i32
  }
  func.func @transform_1(%arg0: i32) -> (i32, i32) {
    %c0_i32 = arith.constant 0 : i32
    %c0_i32_0 = arith.constant 0 : i32
    return %arg0, %c0_i32 : i32, i32
  }
  func.func @transform_2(%arg0: i32) -> (i32, i32) {
    %c0_i32 = arith.constant 0 : i32
    %c0_i32_0 = arith.constant 0 : i32
    return %arg0, %c0_i32 : i32, i32
  }
  func.func @transform_3(%arg0: i32) -> (i32, i32) {
    %c0_i32 = arith.constant 0 : i32
    %c0_i32_0 = arith.constant 0 : i32
    %c0_i32_1 = arith.constant 0 : i32
    return %c0_i32, %c0_i32_0 : i32, i32
  }
  func.func @transform_4(%arg0: i32) -> (i32, i32) {
    %c0_i32 = arith.constant 0 : i32
    %c0_i32_0 = arith.constant 0 : i32
    return %arg0, %c0_i32 : i32, i32
  }
  func.func @transform_5(%arg0: i32) -> (i32, i32) {
    %c0_i32 = arith.constant 0 : i32
    %c0_i32_0 = arith.constant 0 : i32
    return %arg0, %c0_i32 : i32, i32
  }
  func.func @transform_6(%arg0: i32) -> (i32, i32) {
    %c0_i32 = arith.constant 0 : i32
    %c0_i32_0 = arith.constant 0 : i32
    return %arg0, %c0_i32 : i32, i32
  }
  func.func @transform_7(%arg0: i32) -> (i32, i32) {
    %c0_i32 = arith.constant 0 : i32
    %c0_i32_0 = arith.constant 0 : i32
    %c0_i32_1 = arith.constant 0 : i32
    return %c0_i32, %c0_i32_0 : i32, i32
  }
  func.func @transform_8(%arg0: i32) -> (i32, i32) {
    %c0_i32 = arith.constant 0 : i32
    %c0_i32_0 = arith.constant 0 : i32
    %c0_i32_1 = arith.constant 0 : i32
    return %c0_i32, %c0_i32_0 : i32, i32
  }
  func.func @transform_9(%arg0: i32) -> (i32, i32) {
    %c0_i32 = arith.constant 0 : i32
    %c0_i32_0 = arith.constant 0 : i32
    %c0_i32_1 = arith.constant 0 : i32
    return %c0_i32, %c0_i32_0 : i32, i32
  }
  func.func @transform_10(%arg0: i32) -> (i32, i32) {
    %c0_i32 = arith.constant 0 : i32
    %c0_i32_0 = arith.constant 0 : i32
    %c0_i32_1 = arith.constant 0 : i32
    return %c0_i32, %c0_i32_0 : i32, i32
  }
  func.func @transform_11(%arg0: i32) -> (i32, i32) {
    %c0_i32 = arith.constant 0 : i32
    %c0_i32_0 = arith.constant 0 : i32
    %c0_i32_1 = arith.constant 0 : i32
    return %c0_i32, %c0_i32_0 : i32, i32
  }
  func.func @transform_12(%arg0: i32) -> (i32, i32) {
    %c0_i32 = arith.constant 0 : i32
    %c0_i32_0 = arith.constant 0 : i32
    %c0_i32_1 = arith.constant 0 : i32
    return %c0_i32, %c0_i32_0 : i32, i32
  }
  func.func @transform_13(%arg0: i32) -> (i32, i32) {
    %c0_i32 = arith.constant 0 : i32
    %c0_i32_0 = arith.constant 0 : i32
    %c0_i32_1 = arith.constant 0 : i32
    return %c0_i32, %c0_i32_0 : i32, i32
  }
  func.func @transform_14(%arg0: i32) -> (i32, i32) {
    %c0_i32 = arith.constant 0 : i32
    %c0_i32_0 = arith.constant 0 : i32
    %c0_i32_1 = arith.constant 0 : i32
    return %c0_i32, %c0_i32_0 : i32, i32
  }
  func.func @transform_15(%arg0: i32) -> (i32, i32) {
    %c0_i32 = arith.constant 0 : i32
    %c0_i32_0 = arith.constant 0 : i32
    %c0_i32_1 = arith.constant 0 : i32
    return %c0_i32, %c0_i32_0 : i32, i32
  }
  func.func @transform_16(%arg0: i32) -> (i32, i32) {
    %c0_i32 = arith.constant 0 : i32
    %c0_i32_0 = arith.constant 0 : i32
    %c0_i32_1 = arith.constant 0 : i32
    return %c0_i32, %c0_i32_0 : i32, i32
  }
  func.func @transform_17(%arg0: i32) -> (i32, i32) {
    %c0_i32 = arith.constant 0 : i32
    %c0_i32_0 = arith.constant 0 : i32
    %c0_i32_1 = arith.constant 0 : i32
    return %c0_i32, %c0_i32_0 : i32, i32
  }
  func.func @transform_18(%arg0: i32) -> (i32, i32) {
    %c0_i32 = arith.constant 0 : i32
    %c0_i32_0 = arith.constant 0 : i32
    return %arg0, %c0_i32 : i32, i32
  }
  func.func @transform_19(%arg0: i32) -> (i32, i32, i32) {
    %c0_i32 = arith.constant 0 : i32
    %c0_i32_0 = arith.constant 0 : i32
    %c0_i32_1 = arith.constant 0 : i32
    return %arg0, %c0_i32, %c0_i32_0 : i32, i32, i32
  }
}

</mosaic_0001>

<bundles_post_ra>
// kernel: tpu_custom_call.1
= control target key start
LH: loop header
LB: loop body
LE: loop exit
PB: predicated region body
PF: predicated region fallthrough
CT: control target
= control target key end

     0   :  { %s2707_s0 = inlined_call_operand.hbm [shape: bf16[24,64], index: 0, kind: input, shape index: {}]   ;;  %s2708_s1 = inlined_call_operand.hbm [shape: bf16[24,64], index: 1, kind: input, shape index: {}]   ;;  %s2709_s2 = inlined_call_operand.hbm [shape: f32[24,32], index: 2, kind: input, shape index: {}]   ;;  %s2710_s3 = inlined_call_operand.hbm [shape: bf16[32,32], index: 3, kind: input, shape index: {}]   ;;  %s2711_s4 = inlined_call_operand.hbm [shape: bf16[24,32], index: 4, kind: input, shape index: {}]   ;;  %s2712_s5 = inlined_call_operand.hbm [shape: bf16[24,32], index: 5, kind: input, shape index: {}]   ;;  %s2713_s6 = inlined_call_operand.hbm [shape: f32[24,128], index: 6, kind: input, shape index: {}]   ;;  %s2714_s7 = inlined_call_operand.hbm [shape: f32[1,128], index: 7, kind: input, shape index: {}]   ;;  %s2715_s8 = inlined_call_operand.hbm [shape: bf16[32,32], index: 8, kind: input, shape index: {}]   ;;  %s2716_s9 = inlined_call_operand.hbm [shape: bf16[32,32], index: 9, kind: input, shape index: {}]   ;;  %s2717_s10 = inlined_call_operand.hbm [shape: f32[1,32], index: 10, kind: input, shape index: {}]   ;;  %s2718_s11 = inlined_call_operand.hbm [shape: bf16[32,32], index: 11, kind: input, shape index: {}]   ;;  %s2719_s12 = inlined_call_operand.hbm [shape: bf16[32,32], index: 12, kind: input, shape index: {}]   ;;  %s2720_s13 = inlined_call_operand.hbm [shape: f32[1,32], index: 13, kind: input, shape index: {}]   ;;  %s2721_s14 = inlined_call_operand.hbm [shape: bf16[32,256], index: 14, kind: input, shape index: {}]   ;;  %s2722_s15 = inlined_call_operand.hbm [shape: bf16[32,256], index: 15, kind: input, shape index: {}]   ;;  %s2723_s16 = inlined_call_operand.hbm [shape: bf16[256,128], index: 16, kind: input, shape index: {}]   ;;  %s2724_s17 = inlined_call_operand.hbm [shape: f32[1,128], index: 17, kind: input, shape index: {}]   ;;  %s2725_s18 = inlined_call_operand.hbm [shape: f32[24,128], index: 18, kind: output, shape index: {0}]   ;;  %s2726_s19 = inlined_call_operand.hbm [shape: f32[1,8,128], index: 19, kind: output, shape index: {1}]  }
   0x1   :  { %2733 = sst [smem:[#allocation46_spill]] %s2707_s0 }
   0x2   :  { %2734 = sst [smem:[#allocation47_spill]] %s2708_s1 }
   0x3   :  { %2735 = sst [smem:[#allocation48_spill]] %s2709_s2 }
   0x4   :  { %2736 = sst [smem:[#allocation49_spill]] %s2710_s3 }
   0x5   :  { %2737 = sst [smem:[#allocation50_spill]] %s2725_s18 }
   0x6   :  { %2738 = sst [smem:[#allocation51_spill]] %s2726_s19 }
   0x7   :  { %25 = vsyncpa [#allocation3], 0 }
   0x8   :  { %26 = vsyncpa [#allocation6], 0 }
   0x9   :  { %27 = vsyncpa [#allocation9], 0 }
   0xa   :  { %28 = vsyncpa [#allocation12], 0 }
   0xb   :  { %29 = vsyncpa [#allocation15], 0 }
   0xc   :  { %30 = vsyncpa [#allocation18], 0 }
   0xd   :  { %31 = vsyncpa [#allocation21], 0 }
   0xe   :  { %32 = vsyncpa [#allocation24], 0 }
   0xf   :  { %33 = vsyncpa [#allocation27], 0 }
  0x10   :  { %34 = vsyncpa [#allocation30], 0 }
  0x11   :  { %35 = vsyncpa [#allocation4], 0 }
  0x12   :  { %36 = vsyncpa [#allocation33], 0  ;;  %s2143_s0 = smov [#allocation5]   ;;  %s2144_s20 = smov [#allocation8]  }
  0x13   :  { %s54_s30 = sshll.u32 %s2143_s0, 4  ;;  %s78_s21 = sshll.u32 %s2144_s20, 4  ;;  %s55_s30 = int_to_ptr.vmem [resolvable:$true] %s54_s30  ;;  %s2273_s21 = int_to_ptr.vmem [resolvable:$true] %s78_s21 }
  0x14   :  { %s2739_s2 = sld [smem:[#allocation47_spill]] }
  0x1a   :  { %s1679_s23 = scalar_lea.hbm %s2739_s2, 192 }
  0x1b   :  { %p1680_p0 = scmp.ne.s32.totalorder %s2739_s2, %s1679_s23  ;;  %p1683_p1 = scmp.lt.u32.totalorder %s1679_s23, %s2739_s2 }
  0x1d   :  { %p1685_p2 = pnand %p1683_p1, %p1680_p0 }
  0x1f   :  { %1688 = shalt.err (!%p1685_p2)
}
  0x20   :  { %s1689_s27 = scalar_lea.vmem %s55_s30, 192  ;;  %p1694_p4 = scmp.lt.s32.totalorder %s55_s30, %s55_s30 }
  0x21   :  { %p1690_p3 = scmp.ne.s32.totalorder %s55_s30, %s1689_s27  ;;  %p1695_p5 = scmp.lt.s32.totalorder %s1689_s27, %s1689_s27 }
  0x23   :  { %p1696_p6 = por %p1695_p5, %p1694_p4 }
  0x25   :  { %p1697_p7 = pnand %p1696_p6, %p1690_p3 }
  0x27   :  { %1700 = shalt.err (!%p1697_p7)
}
  0x28   :  { %s2145_s28 = smov 64   ;;  %s2146_s29 = smov 4  }
  0x29   :  { %60 = dma.hbm_to_vmem [thread:$0]  %s2739_s2, 192, %s55_s30, [#allocation6], %s2145_s28, %s2145_s28, %s2146_s29  }
  0x2a   :  { %s2740_s23 = sld [smem:[#allocation49_spill]] }
  0x30   :  { %s1701_s24 = scalar_lea.hbm %s2740_s23, 256 }
  0x31   :  { %p1702_p8 = scmp.ne.s32.totalorder %s2740_s23, %s1701_s24  ;;  %p1705_p9 = scmp.lt.u32.totalorder %s1701_s24, %s2740_s23 }
  0x33   :  { %p1707_p10 = pnand %p1705_p9, %p1702_p8 }
  0x35   :  { %1710 = shalt.err (!%p1707_p10)
}
  0x36   :  { %s1711_s19 = scalar_lea.vmem %s2273_s21, 256  ;;  %p1716_p12 = scmp.lt.s32.totalorder %s2273_s21, %s2273_s21 }
  0x37   :  { %p1712_p11 = scmp.ne.s32.totalorder %s2273_s21, %s1711_s19  ;;  %p1717_p13 = scmp.lt.s32.totalorder %s1711_s19, %s1711_s19 }
  0x39   :  { %p1718_p0 = por %p1717_p13, %p1716_p12 }
  0x3b   :  { %p1719_p1 = pnand %p1718_p0, %p1712_p11 }
  0x3d   :  { %1722 = shalt.err (!%p1719_p1)
}
  0x3e   :  { %84 = dma.hbm_to_vmem [thread:$0]  %s2740_s23, 256, %s2273_s21, [#allocation9], %s2145_s28, %s2145_s28, %s2146_s29  }
  0x3f   :  { %s2147_s0 = smov [#allocation11]   ;;  %s2148_s1 = smov [#allocation14]  }
  0x40   :  { %s102_s20 = sshll.u32 %s2147_s0, 4  ;;  %s127_s22 = sshll.u32 %s2148_s1, 4  ;;  %s103_s20 = int_to_ptr.vmem [resolvable:$true] %s102_s20  ;;  %s128_s22 = int_to_ptr.vmem [resolvable:$true] %s127_s22 }
  0x41   :  { %s1723_s19 = scalar_lea.hbm %s2712_s5, 192 }
  0x42   :  { %p1724_p2 = scmp.ne.s32.totalorder %s2712_s5, %s1723_s19  ;;  %p1727_p3 = scmp.lt.u32.totalorder %s1723_s19, %s2712_s5 }
  0x44   :  { %p1729_p4 = pnand %p1727_p3, %p1724_p2 }
  0x46   :  { %1732 = shalt.err (!%p1729_p4)
}
  0x47   :  { %s1733_s21 = scalar_lea.vmem %s103_s20, 192  ;;  %p1738_p6 = scmp.lt.s32.totalorder %s103_s20, %s103_s20 }
  0x48   :  { %p1734_p5 = scmp.ne.s32.totalorder %s103_s20, %s1733_s21  ;;  %p1739_p7 = scmp.lt.s32.totalorder %s1733_s21, %s1733_s21 }
  0x4a   :  { %p1740_p8 = por %p1739_p7, %p1738_p6 }
  0x4c   :  { %p1741_p9 = pnand %p1740_p8, %p1734_p5 }
  0x4e   :  { %1744 = shalt.err (!%p1741_p9)
}
  0x4f   :  { %108 = dma.hbm_to_vmem [thread:$0]  %s2712_s5, 192, %s103_s20, [#allocation12], %s2145_s28, %s2145_s28, %s2146_s29  }
  0x50   :  { %s1745_s18 = scalar_lea.hbm %s2714_s7, 16 }
  0x51   :  { %p1746_p10 = scmp.ne.s32.totalorder %s2714_s7, %s1745_s18  ;;  %p1749_p11 = scmp.lt.u32.totalorder %s1745_s18, %s2714_s7 }
  0x53   :  { %p1751_p12 = pnand %p1749_p11, %p1746_p10 }
  0x55   :  { %1754 = shalt.err (!%p1751_p12)
}
  0x56   :  { %s1755_s3 = scalar_lea.vmem %s128_s22, 16  ;;  %s1759_s26 = scalar_lea.vmem %s128_s22, 32 }
  0x57   :  { %p1756_p13 = scmp.ne.s32.totalorder %s128_s22, %s1755_s3  ;;  %p1760_p0 = scmp.lt.s32.totalorder %s128_s22, %s128_s22 }
  0x58   :  { %p1761_p1 = scmp.lt.s32.totalorder %s1759_s26, %s1755_s3 }
  0x5a   :  { %p1762_p2 = por %p1761_p1, %p1760_p0 }
  0x5c   :  { %p1763_p3 = pnand %p1762_p2, %p1756_p13 }
  0x5e   :  { %1766 = shalt.err (!%p1763_p3)
}
  0x5f   :  { %130 = dma.hbm_to_vmem [thread:$0]  %s2714_s7, 16, %s128_s22, [#allocation15]  }
  0x60   :  { %s2149_s27 = smov [#allocation17]   ;;  %s2150_s23 = smov [#allocation20]  }
  0x61   :  { %s148_s21 = sshll.u32 %s2149_s27, 4  ;;  %s170_s30 = sshll.u32 %s2150_s23, 4  ;;  %s149_s21 = int_to_ptr.vmem [resolvable:$true] %s148_s21  ;;  %s2337_s30 = int_to_ptr.vmem [resolvable:$true] %s170_s30 }
  0x62   :  { %s1767_s18 = scalar_lea.hbm %s2716_s9, 256 }
  0x63   :  { %p1768_p4 = scmp.ne.s32.totalorder %s2716_s9, %s1767_s18  ;;  %p1771_p5 = scmp.lt.u32.totalorder %s1767_s18, %s2716_s9 }
  0x65   :  { %p1773_p6 = pnand %p1771_p5, %p1768_p4 }
  0x67   :  { %1776 = shalt.err (!%p1773_p6)
}
  0x68   :  { %s1777_s7 = scalar_lea.vmem %s149_s21, 256  ;;  %p1782_p8 = scmp.lt.s32.totalorder %s149_s21, %s149_s21 }
  0x69   :  { %p1778_p7 = scmp.ne.s32.totalorder %s149_s21, %s1777_s7  ;;  %p1783_p9 = scmp.lt.s32.totalorder %s1777_s7, %s1777_s7 }
  0x6b   :  { %p1784_p10 = por %p1783_p9, %p1782_p8 }
  0x6d   :  { %p1785_p11 = pnand %p1784_p10, %p1778_p7 }
  0x6f   :  { %1788 = shalt.err (!%p1785_p11)
}
  0x70   :  { %154 = dma.hbm_to_vmem [thread:$0]  %s2716_s9, 256, %s149_s21, [#allocation18], %s2145_s28, %s2145_s28, %s2146_s29  }
  0x71   :  { %s1789_s20 = scalar_lea.hbm %s2718_s11, 256 }
  0x72   :  { %p1790_p12 = scmp.ne.s32.totalorder %s2718_s11, %s1789_s20  ;;  %p1793_p13 = scmp.lt.u32.totalorder %s1789_s20, %s2718_s11 }
  0x74   :  { %p1795_p0 = pnand %p1793_p13, %p1790_p12 }
  0x76   :  { %1798 = shalt.err (!%p1795_p0)
}
  0x77   :  { %s1799_s18 = scalar_lea.vmem %s2337_s30, 256  ;;  %p1804_p2 = scmp.lt.s32.totalorder %s2337_s30, %s2337_s30 }
  0x78   :  { %p1800_p1 = scmp.ne.s32.totalorder %s2337_s30, %s1799_s18  ;;  %p1805_p3 = scmp.lt.s32.totalorder %s1799_s18, %s1799_s18 }
  0x7a   :  { %p1806_p4 = por %p1805_p3, %p1804_p2 }
  0x7c   :  { %p1807_p5 = pnand %p1806_p4, %p1800_p1 }
  0x7e   :  { %1810 = shalt.err (!%p1807_p5)
}
  0x7f   :  { %176 = dma.hbm_to_vmem [thread:$0]  %s2718_s11, 256, %s2337_s30, [#allocation21], %s2145_s28, %s2145_s28, %s2146_s29  }
  0x80   :  { %s2151_s1 = smov [#allocation23]   ;;  %s1811_s7 = scalar_lea.hbm %s2720_s13, 16 }
  0x81   :  { %s195_s24 = sshll.u32 %s2151_s1, 4  ;;  %p1812_p6 = scmp.ne.s32.totalorder %s2720_s13, %s1811_s7  ;;  %s196_s24 = int_to_ptr.vmem [resolvable:$true] %s195_s24 }
  0x82   :  { %p1815_p7 = scmp.lt.u32.totalorder %s1811_s7, %s2720_s13 }
  0x84   :  { %p1817_p8 = pnand %p1815_p7, %p1812_p6 }
  0x86   :  { %1820 = shalt.err (!%p1817_p8)
}
  0x87   :  { %s1821_s20 = scalar_lea.vmem %s196_s24, 16  ;;  %s1825_s11 = scalar_lea.vmem %s196_s24, 32 }
  0x88   :  { %p1822_p9 = scmp.ne.s32.totalorder %s196_s24, %s1821_s20  ;;  %p1826_p10 = scmp.lt.s32.totalorder %s196_s24, %s196_s24 }
  0x89   :  { %p1827_p11 = scmp.lt.s32.totalorder %s1825_s11, %s1821_s20 }
  0x8b   :  { %p1828_p12 = por %p1827_p11, %p1826_p10 }
  0x8d   :  { %p1829_p13 = pnand %p1828_p12, %p1822_p9 }
  0x8f   :  { %1832 = shalt.err (!%p1829_p13)
}
  0x90   :  { %198 = dma.hbm_to_vmem [thread:$0]  %s2720_s13, 16, %s196_s24, [#allocation24]  }
  0x91   :  { %s2152_s23 = smov [#allocation26]   ;;  %s2153_s0 = smov [#allocation2]  }
  0x92   :  { %s216_s2 = sshll.u32 %s2152_s23, 4  ;;  %s42_s18 = sshll.u32 %s2153_s0, 4  ;;  %s217_s2 = int_to_ptr.vmem [resolvable:$true] %s216_s2  ;;  %s43_s18 = int_to_ptr.vmem [resolvable:$true] %s42_s18 }
  0x93   :  { %s1833_s1 = scalar_lea.hbm %s2722_s15, 512 }
  0x94   :  { %p1834_p0 = scmp.ne.s32.totalorder %s2722_s15, %s1833_s1  ;;  %p1837_p1 = scmp.lt.u32.totalorder %s1833_s1, %s2722_s15 }
  0x96   :  { %p1839_p2 = pnand %p1837_p1, %p1834_p0 }
  0x98   :  { %1842 = shalt.err (!%p1839_p2)
}
  0x99   :  { %s1843_s13 = scalar_lea.vmem %s217_s2, 512  ;;  %p1848_p4 = scmp.lt.s32.totalorder %s217_s2, %s217_s2 }
  0x9a   :  { %p1844_p3 = scmp.ne.s32.totalorder %s217_s2, %s1843_s13  ;;  %p1849_p5 = scmp.lt.s32.totalorder %s1843_s13, %s1843_s13 }
  0x9c   :  { %p1850_p6 = por %p1849_p5, %p1848_p4 }
  0x9e   :  { %p1851_p7 = pnand %p1850_p6, %p1844_p3 }
  0xa0   :  { %1854 = shalt.err (!%p1851_p7)
}
  0xa1   :  { %s2154_s24 = smov 128   ;;  %s2155_s3 = smov 8  }
  0xa2   :  { %222 = dma.hbm_to_vmem [thread:$0]  %s2722_s15, 512, %s217_s2, [#allocation27], %s2154_s24, %s2154_s24, %s2155_s3  }
  0xa3   :  { %s2741_s30 = sld [smem:[#allocation46_spill]] }
  0xa9   :  { %s1855_s27 = scalar_lea.hbm %s2741_s30, 192 }
  0xaa   :  { %p1856_p8 = scmp.ne.s32.totalorder %s2741_s30, %s1855_s27  ;;  %p1859_p9 = scmp.lt.u32.totalorder %s1855_s27, %s2741_s30 }
  0xac   :  { %p1861_p10 = pnand %p1859_p9, %p1856_p8 }
  0xae   :  { %1864 = shalt.err (!%p1861_p10)
}
  0xaf   :  { %s1865_s1 = scalar_lea.vmem %s43_s18, 192  ;;  %p1870_p12 = scmp.lt.s32.totalorder %s43_s18, %s43_s18 }
  0xb0   :  { %p1866_p11 = scmp.ne.s32.totalorder %s43_s18, %s1865_s1  ;;  %p1871_p13 = scmp.lt.s32.totalorder %s1865_s1, %s1865_s1 }
  0xb2   :  { %p1872_p0 = por %p1871_p13, %p1870_p12 }
  0xb4   :  { %p1873_p1 = pnand %p1872_p0, %p1866_p11 }
  0xb6   :  { %1876 = shalt.err (!%p1873_p1)
}
  0xb7   :  { %48 = dma.hbm_to_vmem [thread:$0]  %s2741_s30, 192, %s43_s18, [#allocation3], %s2145_s28, %s2145_s28, %s2146_s29  }
  0xb8   :  { %s2156_s25 = smov [#allocation7]   ;;  %s2157_s7 = smov [#allocation10]  }
  0xb9   :  { %s66_s19 = sshll.u32 %s2156_s25, 4  ;;  %s90_s22 = sshll.u32 %s2157_s7, 4  ;;  %s67_s19 = int_to_ptr.vmem [resolvable:$true] %s66_s19  ;;  %s91_s22 = int_to_ptr.vmem [resolvable:$true] %s90_s22 }
  0xba   :  { %s2742_s5 = sld [smem:[#allocation48_spill]] }
  0xc0   :  { %s1877_s20 = scalar_lea.hbm %s2742_s5, 384 }
  0xc1   :  { %p1878_p2 = scmp.ne.s32.totalorder %s2742_s5, %s1877_s20  ;;  %p1881_p3 = scmp.lt.u32.totalorder %s1877_s20, %s2742_s5 }
  0xc3   :  { %p1883_p4 = pnand %p1881_p3, %p1878_p2 }
  0xc5   :  { %1886 = shalt.err (!%p1883_p4)
}
  0xc6   :  { %s1887_s18 = scalar_lea.vmem %s67_s19, 384  ;;  %p1892_p6 = scmp.lt.s32.totalorder %s67_s19, %s67_s19 }
  0xc7   :  { %p1888_p5 = scmp.ne.s32.totalorder %s67_s19, %s1887_s18  ;;  %p1893_p7 = scmp.lt.s32.totalorder %s1887_s18, %s1887_s18 }
  0xc9   :  { %p1894_p8 = por %p1893_p7, %p1892_p6 }
  0xcb   :  { %p1895_p9 = pnand %p1894_p8, %p1888_p5 }
  0xcd   :  { %1898 = shalt.err (!%p1895_p9)
}
  0xce   :  { %72 = dma.hbm_to_vmem [thread:$0]  %s2742_s5, 384, %s67_s19, [#allocation6], %s2154_s24, %s2154_s24, %s2155_s3  }
  0xcf   :  { %s1899_s15 = scalar_lea.hbm %s2711_s4, 192 }
  0xd0   :  { %p1900_p10 = scmp.ne.s32.totalorder %s2711_s4, %s1899_s15  ;;  %p1903_p11 = scmp.lt.u32.totalorder %s1899_s15, %s2711_s4 }
  0xd2   :  { %p1905_p12 = pnand %p1903_p11, %p1900_p10 }
  0xd4   :  { %1908 = shalt.err (!%p1905_p12)
}
  0xd5   :  { %s1909_s26 = scalar_lea.vmem %s91_s22, 192  ;;  %p1914_p0 = scmp.lt.s32.totalorder %s91_s22, %s91_s22 }
  0xd6   :  { %p1910_p13 = scmp.ne.s32.totalorder %s91_s22, %s1909_s26  ;;  %p1915_p1 = scmp.lt.s32.totalorder %s1909_s26, %s1909_s26 }
  0xd8   :  { %p1916_p2 = por %p1915_p1, %p1914_p0 }
  0xda   :  { %p1917_p3 = pnand %p1916_p2, %p1910_p13 }
  0xdc   :  { %1920 = shalt.err (!%p1917_p3)
}
  0xdd   :  { %96 = dma.hbm_to_vmem [thread:$0]  %s2711_s4, 192, %s91_s22, [#allocation9], %s2145_s28, %s2145_s28, %s2146_s29  }
  0xde   :  { %s2158_s20 = smov [#allocation13]   ;;  %s2159_s27 = smov [#allocation16]  }
  0xdf   :  { %s114_s11 = sshll.u32 %s2158_s20, 4  ;;  %s136_s23 = sshll.u32 %s2159_s27, 4  ;;  %s115_s11 = int_to_ptr.vmem [resolvable:$true] %s114_s11  ;;  %s137_s23 = int_to_ptr.vmem [resolvable:$true] %s136_s23 }
  0xe0   :  { %s1921_s30 = scalar_lea.hbm %s2713_s6, 384 }
  0xe1   :  { %p1922_p4 = scmp.ne.s32.totalorder %s2713_s6, %s1921_s30  ;;  %p1925_p5 = scmp.lt.u32.totalorder %s1921_s30, %s2713_s6 }
  0xe3   :  { %p1927_p6 = pnand %p1925_p5, %p1922_p4 }
  0xe5   :  { %1930 = shalt.err (!%p1927_p6)
}
  0xe6   :  { %s1931_s4 = scalar_lea.vmem %s115_s11, 384  ;;  %p1936_p8 = scmp.lt.s32.totalorder %s115_s11, %s115_s11 }
  0xe7   :  { %p1932_p7 = scmp.ne.s32.totalorder %s115_s11, %s1931_s4  ;;  %p1937_p9 = scmp.lt.s32.totalorder %s1931_s4, %s1931_s4 }
  0xe9   :  { %p1938_p10 = por %p1937_p9, %p1936_p8 }
  0xeb   :  { %p1939_p11 = pnand %p1938_p10, %p1932_p7 }
  0xed   :  { %1942 = shalt.err (!%p1939_p11)
}
  0xee   :  { %120 = dma.hbm_to_vmem [thread:$0]  %s2713_s6, 384, %s115_s11, [#allocation12], %s2154_s24, %s2154_s24, %s2155_s3  }
  0xef   :  { %s1943_s13 = scalar_lea.hbm %s2715_s8, 256 }
  0xf0   :  { %p1944_p12 = scmp.ne.s32.totalorder %s2715_s8, %s1943_s13  ;;  %p1947_p13 = scmp.lt.u32.totalorder %s1943_s13, %s2715_s8 }
  0xf2   :  { %p1949_p0 = pnand %p1947_p13, %p1944_p12 }
  0xf4   :  { %1952 = shalt.err (!%p1949_p0)
}
  0xf5   :  { %s1953_s27 = scalar_lea.vmem %s137_s23, 256  ;;  %p1958_p2 = scmp.lt.s32.totalorder %s137_s23, %s137_s23 }
  0xf6   :  { %p1954_p1 = scmp.ne.s32.totalorder %s137_s23, %s1953_s27  ;;  %p1959_p3 = scmp.lt.s32.totalorder %s1953_s27, %s1953_s27 }
  0xf8   :  { %p1960_p4 = por %p1959_p3, %p1958_p2 }
  0xfa   :  { %p1961_p5 = pnand %p1960_p4, %p1954_p1 }
  0xfc   :  { %1964 = shalt.err (!%p1961_p5)
}
  0xfd   :  { %142 = dma.hbm_to_vmem [thread:$0]  %s2715_s8, 256, %s137_s23, [#allocation15], %s2145_s28, %s2145_s28, %s2146_s29  }
  0xfe   :  { %s2160_s0 = smov [#allocation19]   ;;  %s2161_s30 = smov [#allocation22]  }
  0xff   :  { %s161_s18 = sshll.u32 %s2160_s0, 4  ;;  %s182_s9 = sshll.u32 %s2161_s30, 4  ;;  %s162_s18 = int_to_ptr.vmem [resolvable:$true] %s161_s18  ;;  %s183_s9 = int_to_ptr.vmem [resolvable:$true] %s182_s9 }
 0x100   :  { %s1965_s15 = scalar_lea.hbm %s2717_s10, 16 }
 0x101   :  { %p1966_p6 = scmp.ne.s32.totalorder %s2717_s10, %s1965_s15  ;;  %p1969_p7 = scmp.lt.u32.totalorder %s1965_s15, %s2717_s10 }
 0x103   :  { %p1971_p8 = pnand %p1969_p7, %p1966_p6 }
 0x105   :  { %1974 = shalt.err (!%p1971_p8)
}
 0x106   :  { %s1975_s8 = scalar_lea.vmem %s162_s18, 16  ;;  %s1979_s23 = scalar_lea.vmem %s162_s18, 32 }
 0x107   :  { %p1976_p9 = scmp.ne.s32.totalorder %s162_s18, %s1975_s8  ;;  %p1980_p10 = scmp.lt.s32.totalorder %s162_s18, %s162_s18 }
 0x108   :  { %p1981_p11 = scmp.lt.s32.totalorder %s1979_s23, %s1975_s8 }
 0x10a   :  { %p1982_p12 = por %p1981_p11, %p1980_p10 }
 0x10c   :  { %p1983_p13 = pnand %p1982_p12, %p1976_p9 }
 0x10e   :  { %1986 = shalt.err (!%p1983_p13)
}
 0x10f   :  { %164 = dma.hbm_to_vmem [thread:$0]  %s2717_s10, 16, %s162_s18, [#allocation18]  }
 0x110   :  { %s1987_s5 = scalar_lea.hbm %s2719_s12, 256 }
 0x111   :  { %p1988_p0 = scmp.ne.s32.totalorder %s2719_s12, %s1987_s5  ;;  %p1991_p1 = scmp.lt.u32.totalorder %s1987_s5, %s2719_s12 }
 0x113   :  { %p1993_p2 = pnand %p1991_p1, %p1988_p0 }
 0x115   :  { %1996 = shalt.err (!%p1993_p2)
}
 0x116   :  { %s1997_s0 = scalar_lea.vmem %s183_s9, 256  ;;  %p2002_p4 = scmp.lt.s32.totalorder %s183_s9, %s183_s9 }
 0x117   :  { %p1998_p3 = scmp.ne.s32.totalorder %s183_s9, %s1997_s0  ;;  %p2003_p5 = scmp.lt.s32.totalorder %s1997_s0, %s1997_s0 }
 0x119   :  { %p2004_p6 = por %p2003_p5, %p2002_p4 }
 0x11b   :  { %p2005_p7 = pnand %p2004_p6, %p1998_p3 }
 0x11d   :  { %2008 = shalt.err (!%p2005_p7)
}
 0x11e   :  { %188 = dma.hbm_to_vmem [thread:$0]  %s2719_s12, 256, %s183_s9, [#allocation21], %s2145_s28, %s2145_s28, %s2146_s29  }
 0x11f   :  { %s2162_s30 = smov [#allocation25]   ;;  %s2163_s1 = smov [#allocation28]  }
 0x120   :  { %s204_s21 = sshll.u32 %s2162_s30, 4  ;;  %s228_s15 = sshll.u32 %s2163_s1, 4  ;;  %s205_s21 = int_to_ptr.vmem [resolvable:$true] %s204_s21  ;;  %s229_s15 = int_to_ptr.vmem [resolvable:$true] %s228_s15 }
 0x121   :  { %s2009_s2 = scalar_lea.hbm %s2721_s14, 512 }
 0x122   :  { %p2010_p8 = scmp.ne.s32.totalorder %s2721_s14, %s2009_s2  ;;  %p2013_p9 = scmp.lt.u32.totalorder %s2009_s2, %s2721_s14 }
 0x124   :  { %p2015_p10 = pnand %p2013_p9, %p2010_p8 }
 0x126   :  { %2018 = shalt.err (!%p2015_p10)
}
 0x127   :  { %s2019_s12 = scalar_lea.vmem %s205_s21, 512  ;;  %p2024_p12 = scmp.lt.s32.totalorder %s205_s21, %s205_s21 }
 0x128   :  { %p2020_p11 = scmp.ne.s32.totalorder %s205_s21, %s2019_s12  ;;  %p2025_p13 = scmp.lt.s32.totalorder %s2019_s12, %s2019_s12 }
 0x12a   :  { %p2026_p0 = por %p2025_p13, %p2024_p12 }
 0x12c   :  { %p2027_p1 = pnand %p2026_p0, %p2020_p11 }
 0x12e   :  { %2030 = shalt.err (!%p2027_p1)
}
 0x12f   :  { %210 = dma.hbm_to_vmem [thread:$0]  %s2721_s14, 512, %s205_s21, [#allocation24], %s2154_s24, %s2154_s24, %s2155_s3  }
 0x130   :  { %s2031_s5 = scalar_lea.hbm %s2723_s16, 2048 }
 0x131   :  { %p2032_p2 = scmp.ne.s32.totalorder %s2723_s16, %s2031_s5  ;;  %p2035_p3 = scmp.lt.u32.totalorder %s2031_s5, %s2723_s16 }
 0x133   :  { %p2037_p4 = pnand %p2035_p3, %p2032_p2 }
 0x135   :  { %2040 = shalt.err (!%p2037_p4)
}
 0x136   :  { %s2041_s0 = scalar_lea.vmem %s229_s15, 2048  ;;  %p2046_p6 = scmp.lt.s32.totalorder %s229_s15, %s229_s15 }
 0x137   :  { %p2042_p5 = scmp.ne.s32.totalorder %s229_s15, %s2041_s0  ;;  %p2047_p7 = scmp.lt.s32.totalorder %s2041_s0, %s2041_s0 }
 0x139   :  { %p2048_p8 = por %p2047_p7, %p2046_p6 }
 0x13b   :  { %p2049_p9 = pnand %p2048_p8, %p2042_p5 }
 0x13d   :  { %2052 = shalt.err (!%p2049_p9)
}
 0x13e   :  { %234 = dma.hbm_to_vmem [thread:$0]  %s2723_s16, 2048, %s229_s15, [#allocation27], %s2145_s28, %s2145_s28, %s2146_s29  }
 0x13f   :  { %s2164_s18 = smov [#allocation29]   ;;  %s2053_s4 = scalar_lea.hbm %s2724_s17, 16 }
 0x140   :  { %s241_s30 = sshll.u32 %s2164_s18, 4  ;;  %p2054_p10 = scmp.ne.s32.totalorder %s2724_s17, %s2053_s4  ;;  %s242_s30 = int_to_ptr.vmem [resolvable:$true] %s241_s30 }
 0x141   :  { %p2057_p11 = scmp.lt.u32.totalorder %s2053_s4, %s2724_s17 }
 0x143   :  { %p2059_p12 = pnand %p2057_p11, %p2054_p10 }
 0x145   :  { %2062 = shalt.err (!%p2059_p12)
}
 0x146   :  { %s2063_s23 = scalar_lea.vmem %s242_s30, 16  ;;  %s2067_s16 = scalar_lea.vmem %s242_s30, 32 }
 0x147   :  { %p2064_p13 = scmp.ne.s32.totalorder %s242_s30, %s2063_s23  ;;  %p2068_p0 = scmp.lt.s32.totalorder %s242_s30, %s242_s30 }
 0x148   :  { %p2069_p1 = scmp.lt.s32.totalorder %s2067_s16, %s2063_s23 }
 0x14a   :  { %p2070_p2 = por %p2069_p1, %p2068_p0 }
 0x14c   :  { %p2071_p3 = pnand %p2070_p2, %p2064_p13 }
 0x14e   :  { %2074 = shalt.err (!%p2071_p3)
}
 0x14f   :  { %244 = dma.hbm_to_vmem [thread:$0]  %s2724_s17, 16, %s242_s30, [#allocation30]  }
 0x150   :  { %2119 = dma.done.wait [#allocation3], 192  }
 0x151   :  { %2120 = vsyncadd [#allocation3], 4294967104 }
 0x152   :  { %2121 = dma.done.wait [#allocation6], 576  }
 0x153   :  { %2122 = vsyncadd [#allocation6], 4294966720 }
 0x154   :  { %2123 = dma.done.wait [#allocation9], 448  }
 0x155   :  { %2124 = vsyncadd [#allocation9], 4294966848 }
 0x156   :  { %2125 = dma.done.wait [#allocation12], 576  }
 0x157   :  { %2126 = vsyncadd [#allocation12], 4294966720 }
 0x158   :  { %2127 = dma.done.wait [#allocation15], 272  }
 0x159   :  { %2128 = vsyncadd [#allocation15], 4294967024 }
 0x15a   :  { %2129 = dma.done.wait [#allocation18], 272  }
 0x15b   :  { %2130 = vsyncadd [#allocation18], 4294967024 }
 0x15c   :  { %2131 = dma.done.wait [#allocation21], 512  }
 0x15d   :  { %2132 = vsyncadd [#allocation21], 4294966784 }
 0x15e   :  { %2133 = dma.done.wait [#allocation24], 528  }
 0x15f   :  { %2134 = vsyncadd [#allocation24], 4294966768 }
 0x160   :  { %2135 = dma.done.wait [#allocation27], 2560  }
 0x161   :  { %2136 = vsyncadd [#allocation27], 4294964736 }
 0x162   :  { %2137 = dma.done.wait [#allocation30], 16  }
 0x163   :  { %2138 = vsyncadd [#allocation30], 4294967280  ;;  %v302_v0 = vld [vmem:[#allocation2 + $0x8] sm:$0xf]  ;;  %v308_v1 = vld [vmem:[#allocation5 + $0x8] sm:$0xf] }
 0x164   :  { %v1468_v2 = vld [vmem:[#allocation2] sm:$0xff]   ;;  %v305_v3 = vunpack.c.l.bf16 %v302_v0  ;;  %v311_v4 = vunpack.c.l.bf16 %v308_v1  ;;  %v1472_v6 = vld [vmem:[#allocation5] sm:$0xff]   ;;  %s2165_s17 = smov 112   ;;  %s2166_s15 = smov 96   ;;  %vm357_vm0 = vcmask 130048   ;;  %v1596_v44 = vld [vmem:[#allocation8 + $0x8] sm:$0xff]  }
 0x165   :  { %v1469_v5 = vunpack.c.l.bf16 %v1468_v2  ;;  %v1473_v7 = vunpack.c.l.bf16 %v1472_v6  ;;  %v1470_v8 = vunpack.c.h.bf16 %v1468_v2  ;;  %v1474_v9 = vunpack.c.h.bf16 %v1472_v6  ;;  %s2167_s7 = smov 80   ;;  %v1595_v41 = vld [vmem:[#allocation8] sm:$0xff]   ;;  %v1597_v46 = vld [vmem:[#allocation17] sm:$0xff]   ;;  %s2168_s12 = smov 16   ;;  %v2550_v54 = vld [vmem:[#allocation7] sm:$0xff] }
 0x166   :  { %v314_v10 = vmul.f32 %v311_v4, %v305_v3  ;;  %1523 = vmatprep.subr.bf16.mxu0 %v1595_v41  ;;  %v1598_v49 = vld [vmem:[#allocation22] sm:$0xff]   ;;  %vm379_vm1 = vcmask 261120   ;;  %v1600_v4 = vld [vmem:[#allocation22 + $0x8] sm:$0xff]   ;;  %s2171_s9 = smov [#allocation31]   ;;  %s2172_s26 = smov [#allocation32]  }
 0x167   :  { %v312_v11 = vmul.f32 %v1473_v7, %v1469_v5  ;;  %v313_v12 = vmul.f32 %v1474_v9, %v1470_v8  ;;  %1524 = vmatpush3.bf16.msra.mxu0 %v1595_v41  ;;  %1547 = vmatprep.subr.bf16.mxu1 %v1598_v49  ;;  %v2548_v53 = vld [vmem:[#allocation7 + $0x8] sm:$0xff]  ;;  %v2556_v61 = vld [vmem:[#allocation7 + $0x10] sm:$0xff]  ;;  %v1601_v5 = vld [vmem:[#allocation16] sm:$0xff]   ;;  %s1371_s13 = sshll.u32 %s2171_s9, 4  ;;  %s1384_s19 = sshll.u32 %s2172_s26, 4  ;;  %s1372_s13 = int_to_ptr.vmem [resolvable:$true] %s1371_s13  ;;  %s1385_s19 = int_to_ptr.vmem [resolvable:$true] %s1384_s19 }
 0x168   :  { %322 = vrot.lane.b32.xlu1 %v314_v10, %s2165_s17  ;;  %1525 = vmatprep.subr.bf16.mxu0 %v1596_v44  ;;  %v1599_v3 = vld [vmem:[#allocation17 + $0x8] sm:$0xff]   ;;  %s2075_s5 = scalar_lea.vmem %s1372_s13, 384  ;;  %p2080_p5 = scmp.lt.s32.totalorder %s1372_s13, %s1372_s13 }
 0x169   :  { %318 = vrot.lane.b32.xlu0 %v312_v11, %s2165_s17  ;;  %1548 = vmatpush3.bf16.msra.mxu1 %v1598_v49  ;;  %v1434_v49 = vld [vmem:[#allocation23] ss:$0 sm:$0xff]  ;;  %p2076_p4 = scmp.ne.s32.totalorder %s1372_s13, %s2075_s5  ;;  %p2081_p6 = scmp.lt.s32.totalorder %s2075_s5, %s2075_s5 }
 0x16a   :  { %1549 = vmatprep.subr.bf16.mxu1 %v1600_v4 }
 0x16b   :  { %1526 = vmatpush3.bf16.msra.mxu0 %v1596_v44  ;;  %p2082_p7 = por %p2081_p6, %p2080_p5 }
 0x16c   :  { %330 = vrot.lane.b32.xlu1 %v312_v11, %s2166_s15  ;;  %1531 = vmatprep.subr.bf16.mxu0 %v1597_v46 }
 0x16d   :  { %320 = vrot.lane.b32.xlu0 %v313_v12, %s2165_s17  ;;  %1550 = vmatpush3.bf16.msra.mxu1 %v1600_v4  ;;  %v1625_v4 = vld [vmem:[#allocation28 + $0x50] sm:$0xff]   ;;  %p2083_p8 = pnand %p2082_p7, %p2076_p4 }
 0x170   :  { %334 = vrot.lane.b32.xlu1 %v314_v10, %s2166_s15 }
 0x171   :  { %332 = vrot.lane.b32.xlu0 %v313_v12, %s2166_s15 }
 0x174   :  { %344 = vrot.lane.b32.xlu1 %v313_v12, %s2167_s7 }
 0x175   :  { %342 = vrot.lane.b32.xlu0 %v312_v11, %s2167_s7 }
 0x179   :  { %346 = vrot.lane.b32.xlu0 %v314_v10, %s2167_s7 }
 0x1da   :  { %v323_v13 = vpop.permute.xlu1 %322 }
 0x1db   :  { %v319_v14 = vpop.permute.xlu0 %318  ;;  %v329_v26 = vadd.f32 %v323_v13, %v314_v10  ;;  %v1602_v13 = vld [vmem:[#allocation16 + $0x8] sm:$0xff]  }
 0x1dc   :  { %v327_v20 = vadd.f32 %v319_v14, %v312_v11  ;;  %v1603_v11 = vld [vmem:[#allocation10] sm:$0xff]   ;;  %v1604_v14 = vld [vmem:[#allocation20] sm:$0xff]  }
 0x1de   :  { %v331_v15 = vpop.permute.xlu1 %330 }
 0x1df   :  { %v321_v16 = vpop.permute.xlu0 %320  ;;  %v339_v22 = vadd.f32 %v331_v15, %v327_v20  ;;  %v1605_v15 = vld [vmem:[#allocation10 + $0x8] ss:$0 sps:$4 sm:$0xff]   ;;  %v1609_v20 = vld [vmem:[#allocation25] ss:$8 sps:$4 sm:$0xff]  }
 0x1e0   :  { %v328_v18 = vadd.f32 %v321_v16, %v313_v12  ;;  %v1607_v16 = vld [vmem:[#allocation11] sm:$0xff]  }
 0x1e2   :  { %v335_v17 = vpop.permute.xlu1 %334 }
 0x1e3   :  { %v333_v19 = vpop.permute.xlu0 %332  ;;  %v341_v29 = vadd.f32 %v335_v17, %v329_v26  ;;  %v1606_v17 = vld [vmem:[#allocation20 + $0x8] sm:$0xff]   ;;  %v1620_v26 = vld [vmem:[#allocation26 + $0x14] ss:$8 sps:$4 sm:$0xff]  }
 0x1e4   :  { %v340_v21 = vadd.f32 %v333_v19, %v328_v18  ;;  %v1608_v18 = vld [vmem:[#allocation11 + $0x8] ss:$0 sps:$4 sm:$0xff]   ;;  %v1611_v19 = vld [vmem:[#allocation25 + $0x4] ss:$8 sps:$4 sm:$0xff]  }
 0x1e5   :  { %844 = vmatprep.subr.bf16.mxu1 %v1611_v19  ;;  %v1633_v19 = vld [vmem:[#allocation28 + $0x70] sm:$0xff]  }
 0x1e6   :  { %v345_v23 = vpop.permute.xlu1 %344 }
 0x1e7   :  { %v352_v24 = vadd.f32 %v345_v23, %v340_v21  ;;  %v343_v25 = vpop.permute.xlu0 %342  ;;  %v1614_v21 = vld [vmem:[#allocation25 + $0x14] ss:$8 sps:$4 sm:$0xff]   ;;  %v1617_v23 = vld [vmem:[#allocation26 + $0x4] ss:$8 sps:$4 sm:$0xff]  }
 0x1e8   :  { %v351_v27 = vadd.f32 %v343_v25, %v339_v22  ;;  %v1612_v22 = vld [vmem:[#allocation25 + $0x10] ss:$8 sps:$4 sm:$0xff]   ;;  %v1615_v25 = vld [vmem:[#allocation26] ss:$8 sps:$4 sm:$0xff]  }
 0x1e9   :  { %v355_v28 = vmul.f32 0.25, %v352_v24  ;;  %v2169_v24 = vmov 0  }
 0x1ea   :  { %v354_v30 = vmul.f32 0.25, %v351_v27  ;;  %1593 = vset.pattern.permute.xlu1 %v2169_v24  ;;  %1594 = vset.pattern.permute.xlu0 %v2169_v24  ;;  %v1618_v27 = vld [vmem:[#allocation26 + $0x10] ss:$8 sps:$4 sm:$0xff]  }
 0x1eb   :  { %v347_v31 = vpop.permute.xlu0 %346  ;;  %v361_v32 = vsel %vm357_vm0, %v355_v28, 0.0 }
 0x1ec   :  { %v353_v33 = vadd.f32 %v347_v31, %v341_v29  ;;  %362 = vadd.xlane.f32.xlu0 %v361_v32  ;;  %v358_v34 = vsel %vm357_vm0, %v354_v30, 0.0 }
 0x1ed   :  { %359 = vadd.xlane.f32.xlu1 %v358_v34 }
 0x1ee   :  { %v356_v35 = vmul.f32 0.25, %v353_v33 }
 0x1f0   :  { %v364_v36 = vsel %vm357_vm0, %v356_v35, 0.0 }
 0x1f1   :  { %365 = vadd.xlane.f32.xlu0 %v364_v36 }
 0x279   :  { %v363_v37 = vpop.xlane.xlu0 %362 }
 0x27a   :  { %v360_v38 = vpop.xlane.xlu1 %359  ;;  %v368_v39 = vadd.f32 1e-05, %v363_v37 }
 0x27b   :  { %v367_v40 = vadd.f32 1e-05, %v360_v38 }
 0x27c   :  { %1637 = vrcp.f32 %v368_v39  ;;  %v1423_v39 = vld [vmem:[#allocation19] ss:$0 sm:$0xff] }
 0x27d   :  { %1639 = vrcp.f32 %v367_v40 }
 0x27e   :  { %v366_v42 = vpop.xlane.xlu0 %365 }
 0x27f   :  { %v369_v43 = vadd.f32 1e-05, %v366_v42 }
 0x281   :  { %1641 = vrcp.f32 %v369_v43 }
 0x286   :  { %v1638_v45 = vpop.eup %1637 }
 0x287   :  { %v1640_v47 = vpop.eup %1639  ;;  %v373_v48 = vmul.f32 %v1638_v45, %v355_v28  ;;  %v1621_v28 = vld [vmem:[#allocation28 + $0x40] sm:$0xff]  }
 0x288   :  { %v371_v50 = vmul.f32 %v1640_v47, %v354_v30 }
 0x289   :  { %403 = vrot.lane.b32.xlu0 %v373_v48, %s2168_s12 }
 0x28a   :  { %401 = vrot.lane.b32.xlu1 %v371_v50, %s2168_s12 }
 0x28b   :  { %v1642_v51 = vpop.eup %1641 }
 0x28c   :  { %v375_v52 = vmul.f32 %v1642_v51, %v356_v35 }
 0x28e   :  { %405 = vrot.lane.b32.xlu1 %v375_v52, %s2168_s12 }
 0x2fb   :  { %v404_v55 = vpop.permute.xlu0 %403 }
 0x2fc   :  { %v402_v56 = vpop.permute.xlu1 %401  ;;  %v411_v57 = vsel %vm357_vm0, %v373_v48, %v404_v55 }
 0x2fd   :  { %v410_v58 = vsel %vm357_vm0, %v371_v50, %v402_v56  ;;  %v414_v59 = vmul.f32 %v411_v57, %v2548_v53 }
 0x2fe   :  { %v413_v60 = vmul.f32 %v410_v58, %v2550_v54 }
 0x300   :  { %v406_v62 = vpop.permute.xlu1 %405  ;;  %v416_v63 = vpack.c.bf16 %v414_v59, %v413_v60 }
 0x301   :  { %v412_v0 = vsel %vm357_vm0, %v375_v52, %v406_v62 }
 0x302   :  { %v415_v1 = vmul.f32 %v412_v0, %v2556_v61  ;;  %1527 = vmatprep.mubr.msk.bf16.mxu0 %vm379_vm1, %v416_v63  ;;  %v1622_v0 = vld [vmem:[#allocation28] sm:$0xff]  }
 0x304   :  { %v417_v2 = vpack.c.bf16 %v415_v1, %v415_v1 }
 0x306   :  { %1528 = vmatmul.mubr.msk.bf16.vlgmr.msra.gmra.mrb[0].mxu0 %vm379_vm1, %v417_v2  ;;  %v1623_v2 = vld [vmem:[#allocation28 + $0x48] sm:$0xff]  }
 0x307   :  { %1532 = vmatpush3.bf16.msra.mxu0 %v1597_v46 }
 0x308   :  { %1533 = vmatprep.subr.bf16.mxu0 %v1599_v3 }
 0x30b   :  { %1534 = vmatpush3.bf16.msra.mxu0 %v1599_v3  ;;  %v1624_v3 = vld [vmem:[#allocation28 + $0x8] sm:$0xff]  }
 0x30c   :  { %1539 = vmatprep.subr.bf16.mxu0 %v1601_v5 }
 0x3d9   :  { %v1529_v6 = vpop.f32.mrb[0].mxu0 }
 0x3da   :  { %v474_v7 = vpop.f32.mrb[1].mxu0  ;;  %v489_v12 = vpack.c.bf16 %v1529_v6, %v1529_v6 }
 0x3db   :  { %v1530_v8 = vpop.f32.mrb[2].mxu0 }
 0x3dc   :  { %v477_v9 = vpop.f32.mrb[3].mxu0  ;;  %v1626_v8 = vld [vmem:[#allocation28 + $0x10] sm:$0xff]  }
 0x3dd   :  { %v488_v10 = vpack.c.bf16 %v477_v9, %v474_v7 }
 0x3df   :  { %1535 = vmatprep.mubr.msk.bf16.mxu0 %vm379_vm1, %v488_v10  ;;  %1551 = vmatprep.mubr.msk.bf16.mxu1 %vm379_vm1, %v488_v10 }
 0x3e0   :  { %1536 = vmatmul.mubr.msk.bf16.vlgmr.msra.gmra.mrb[4].mxu0 %vm379_vm1, %v489_v12  ;;  %1552 = vmatmul.mubr.msk.bf16.vlgmr.msra.gmra.mrb[0].mxu1 %vm379_vm1, %v489_v12  ;;  %v1628_v12 = vld [vmem:[#allocation28 + $0x18] sm:$0xff]  }
 0x3e1   :  { %1540 = vmatpush3.bf16.msra.mxu0 %v1601_v5  ;;  %1543 = vmatprep.mubr.msk.bf16.mxu0 %vm379_vm1, %v1603_v11  ;;  %v1627_v11 = vld [vmem:[#allocation28 + $0x58] sm:$0xff]  }
 0x3e2   :  { %1541 = vmatprep.subr.bf16.mxu0 %v1602_v13  ;;  %845 = vmatpush1.bf16.msra.mxu1 %v1609_v20  ;;  %v1634_v20 = vld [vmem:[#allocation28 + $0x30] sm:$0xff]  }
 0x3e3   :  { %846 = vmatprep.subr.bf16.mxu1 %v1614_v21  ;;  %876 = vmatprep.mubr.bf16.mxu1 %v2169_v24  ;;  %v1635_v21 = vld [vmem:[#allocation28 + $0x78] sm:$0xff]  }
 0x3e5   :  { %1542 = vmatpush3.bf16.msra.mxu0 %v1602_v13 }
 0x3e6   :  { %1555 = vmatprep.subr.bf16.mxu0 %v1604_v14  ;;  %847 = vmatpush1.bf16.msra.mxu1 %v1612_v22  ;;  %v1636_v22 = vld [vmem:[#allocation28 + $0x38] sm:$0xff]  }
 0x3e7   :  { %1495 = vmatprep.subr.bf16.mxu1 %v1621_v28 }
 0x3e8   :  { %1544 = vmatmul.mubr.msk.bf16.vlgmr.msra.gmra.mrb[8].mxu0 %vm379_vm1, %v1605_v15  ;;  %v1629_v15 = vld [vmem:[#allocation28 + $0x60] sm:$0xff]  }
 0x3e9   :  { %1556 = vmatpush3.bf16.msra.mxu0 %v1604_v14  ;;  %1559 = vmatprep.mubr.msk.bf16.mxu0 %vm379_vm1, %v1607_v16  ;;  %v1630_v16 = vld [vmem:[#allocation28 + $0x20] sm:$0xff]  }
 0x3ea   :  { %1557 = vmatprep.subr.bf16.mxu0 %v1606_v17 }
 0x3ed   :  { %1558 = vmatpush3.bf16.msra.mxu0 %v1606_v17  ;;  %v1631_v17 = vld [vmem:[#allocation28 + $0x68] sm:$0xff]  }
 0x3ee   :  { %927 = vmatprep.subr.bf16.mxu0 %v1617_v23 }
 0x3f0   :  { %1560 = vmatmul.mubr.msk.bf16.vlgmr.msra.gmra.mrb[12].mxu0 %vm379_vm1, %v1608_v18  ;;  %v1632_v18 = vld [vmem:[#allocation28 + $0x28] sm:$0xff]  }
 0x3f1   :  { %959 = vmatprep.mubr.bf16.mxu0 %v2169_v24  ;;  %928 = vmatpush1.bf16.msra.mxu0 %v1615_v25 }
 0x3f2   :  { %929 = vmatprep.subr.bf16.mxu0 %v1620_v26 }
 0x3f5   :  { %930 = vmatpush1.bf16.msra.mxu0 %v1618_v27 }
 0x4b3   :  { %v1537_v29 = vpop.f32.mrb[4].mxu0  ;;  %v1553_v30 = vpop.f32.mrb[0].mxu1 }
 0x4b4   :  { %v553_v31 = vpop.f32.mrb[5].mxu0  ;;  %v711_v32 = vpop.f32.mrb[1].mxu1 }
 0x4b5   :  { %v1538_v33 = vpop.f32.mrb[6].mxu0  ;;  %v1554_v34 = vpop.f32.mrb[2].mxu1 }
 0x4b6   :  { %v556_v35 = vpop.f32.mrb[7].mxu0  ;;  %v714_v36 = vpop.f32.mrb[3].mxu1 }
 0x4bb   :  { %v1545_v37 = vpop.f32.mrb[8].mxu0 }
 0x4bc   :  { %v636_v38 = vadd.f32 %v1545_v37, %v1537_v29  ;;  %v627_v40 = vpop.f32.mrb[9].mxu0 }
 0x4bd   :  { %v628_v41 = vadd.f32 %v627_v40, %v553_v31  ;;  %v1546_v42 = vpop.f32.mrb[10].mxu0 }
 0x4be   :  { %v630_v43 = vpop.f32.mrb[11].mxu0  ;;  %v650_v51 = vadd.f32 %v1423_v39, %v636_v38 }
 0x4bf   :  { %v648_v44 = vadd.f32 %v1423_v39, %v628_v41  ;;  %v631_v45 = vadd.f32 %v630_v43, %v556_v35 }
 0x4c1   :  { %v649_v46 = vadd.f32 %v1423_v39, %v631_v45  ;;  %1643 = vtanh.f32 %v648_v44 }
 0x4c3   :  { %1645 = vtanh.f32 %v649_v46  ;;  %v1561_v47 = vpop.f32.mrb[12].mxu0 }
 0x4c4   :  { %v794_v48 = vadd.f32 %v1561_v47, %v1553_v30  ;;  %v785_v50 = vpop.f32.mrb[13].mxu0  ;;  %1647 = vtanh.f32 %v650_v51 }
 0x4c5   :  { %v786_v52 = vadd.f32 %v785_v50, %v711_v32  ;;  %v1562_v55 = vpop.f32.mrb[14].mxu0 }
 0x4c6   :  { %v788_v56 = vpop.f32.mrb[15].mxu0  ;;  %v808_v63 = vadd.f32 %v1434_v49, %v794_v48 }
 0x4c7   :  { %v806_v57 = vadd.f32 %v1434_v49, %v786_v52  ;;  %v789_v58 = vadd.f32 %v788_v56, %v714_v36  ;;  %v2583_v52 = vld [vmem:[#allocation14] sm:$0x1]  ;;  %v2590_v56 = vld [vmem:[#allocation13] sm:$0xff] }
 0x4c9   :  { %v807_v59 = vadd.f32 %v1434_v49, %v789_v58  ;;  %1649 = vtanh.f32 %v806_v57  ;;  %v1176_v49 = vlaneseq  ;;  %v2594_v58 = vld [vmem:[#allocation13 + $0x8] sm:$0xff] }
 0x4cb   :  { %1651 = vtanh.f32 %v807_v59  ;;  %v1644_v60 = vpop.eup %1643  ;;  %v2580_v50 = vshrl.u32 %v1176_v49, 7 }
 0x4cc   :  { %1653 = vtanh.f32 %v808_v63 }
 0x4cd   :  { %v1646_v62 = vpop.eup %1645  ;;  %v1178_v51 = vsub.s32 0, %v2580_v50 }
 0x4ce   :  { %v812_v1 = vpack.c.bf16 %v1646_v62, %v1644_v60  ;;  %v1648_v5 = vpop.eup %1647  ;;  %v2598_v62 = vld [vmem:[#allocation13 + $0x10] sm:$0xff] }
 0x4cf   :  { %v813_v9 = vpack.c.bf16 %v1648_v5, %v1648_v5  ;;  %v2588_v55 = vrot.slane %v2583_v52, %v1178_v51 }
 0x4d0   :  { %1439 = vmatmul.mubr.msk.bf16.vlgmr.msra.gmra.mrb[4].mxu1 %vm379_vm1, %v812_v1 }
 0x4d1   :  { %886 = vmatprep.mubr.bf16.mxu1 %v2169_v24  ;;  %1496 = vmatpush3.bf16.msra.mxu1 %v1622_v0  ;;  %v1181_v57 = vadd.f32 %v2588_v55, %v2590_v56  ;;  %v1182_v59 = vadd.f32 %v2588_v55, %v2594_v58  ;;  %v1447_v0 = vld [vmem:[#allocation29] ss:$0 sm:$0xff] }
 0x4d2   :  { %1497 = vmatprep.subr.bf16.mxu1 %v1623_v2 }
 0x4d3   :  { %v1650_v6 = vpop.eup %1649  ;;  %v1184_v60 = vsub.f32 1.0, %v1181_v57  ;;  %v1185_v2 = vsub.f32 1.0, %v1182_v59 }
 0x4d5   :  { %v1652_v7 = vpop.eup %1651  ;;  %1498 = vmatpush3.bf16.msra.mxu1 %v1624_v3  ;;  %v1183_v3 = vadd.f32 %v2588_v55, %v2598_v62 }
 0x4d6   :  { %v895_v10 = vpack.c.bf16 %v1652_v7, %v1650_v6  ;;  %1499 = vmatprep.subr.bf16.mxu1 %v1625_v4  ;;  %v1654_v13 = vpop.eup %1653  ;;  %v1235_v6 = vmul.f32 1e+30, %v2590_v56  ;;  %v1187_v7 = vmul.f32 1e+30, %v1184_v60 }
 0x4d7   :  { %v896_v14 = vpack.c.bf16 %v1654_v13, %v1654_v13 }
 0x4d8   :  { %1440 = vmatmul.mubr.msk.bf16.gmra.mrb[8].mxu1 %vm379_vm1, %v813_v9  ;;  %1445 = vmatmul.mubr.msk.bf16.vlgmr.msra.gmra.mrb[16].mxu0 %vm379_vm1, %v895_v10 }
 0x4d9   :  { %969 = vmatprep.mubr.bf16.mxu0 %v2169_v24  ;;  %1500 = vmatpush3.bf16.msra.mxu1 %v1626_v8 }
 0x4da   :  { %1501 = vmatprep.subr.bf16.mxu1 %v1627_v11  ;;  %v1188_v11 = vmul.f32 1e+30, %v1185_v2 }
 0x4dd   :  { %1502 = vmatpush3.bf16.msra.mxu1 %v1628_v12  ;;  %v1186_v12 = vsub.f32 1.0, %v1183_v3 }
 0x4de   :  { %1503 = vmatprep.subr.bf16.mxu1 %v1629_v15 }
 0x4e0   :  { %1446 = vmatmul.mubr.msk.bf16.gmra.mrb[20].mxu0 %vm379_vm1, %v896_v14 }
 0x4e1   :  { %1504 = vmatpush3.bf16.msra.mxu1 %v1630_v16  ;;  %v1236_v16 = vmul.f32 1e+30, %v2594_v58 }
 0x4e2   :  { %1505 = vmatprep.subr.bf16.mxu1 %v1631_v17 }
 0x4e5   :  { %1506 = vmatpush3.bf16.msra.mxu1 %v1632_v18 }
 0x4e6   :  { %1507 = vmatprep.subr.bf16.mxu1 %v1633_v19  ;;  %v1189_v19 = vmul.f32 1e+30, %v1186_v12 }
 0x4e9   :  { %1508 = vmatpush3.bf16.msra.mxu1 %v1634_v20 }
 0x4ea   :  { %1509 = vmatprep.subr.bf16.mxu1 %v1635_v21 }
 0x4ed   :  { %1510 = vmatpush3.bf16.msra.mxu1 %v1636_v22 }
 0x5a3   :  { %v878_v23 = vpop.f32.mrb[4].mxu1 }
 0x5a4   :  { %v880_v24 = vpop.f32.mrb[5].mxu1 }
 0x5a5   :  { %v882_v25 = vpop.f32.mrb[6].mxu1 }
 0x5a6   :  { %v884_v26 = vpop.f32.mrb[7].mxu1 }
 0x5ab   :  { %v888_v27 = vpop.f32.mrb[8].mxu1  ;;  %v961_v28 = vpop.f32.mrb[16].mxu0 }
 0x5ac   :  { %v978_v29 = vmul.f32 %v961_v28, %v878_v23  ;;  %v890_v30 = vpop.f32.mrb[9].mxu1  ;;  %v963_v31 = vpop.f32.mrb[17].mxu0 }
 0x5ad   :  { %v979_v32 = vmul.f32 %v963_v31, %v880_v24  ;;  %v892_v33 = vpop.f32.mrb[10].mxu1  ;;  %v965_v34 = vpop.f32.mrb[18].mxu0  ;;  %v1237_v24 = vmul.f32 1e+30, %v2598_v62 }
 0x5ae   :  { %v980_v35 = vmul.f32 %v965_v34, %v882_v25  ;;  %v893_v36 = vpop.f32.mrb[11].mxu1  ;;  %v967_v37 = vpop.f32.mrb[19].mxu0 }
 0x5af   :  { %v981_v38 = vmul.f32 %v967_v37, %v884_v26 }
 0x5b0   :  { %v984_v39 = vpack.c.bf16 %v980_v35, %v978_v29 }
 0x5b1   :  { %v985_v40 = vpack.c.bf16 %v981_v38, %v979_v32 }
 0x5b3   :  { %v971_v41 = vpop.f32.mrb[20].mxu0  ;;  %1155 = vmatprep.mubr.bf16.mxu1 %v985_v40 }
 0x5b4   :  { %v982_v42 = vmul.f32 %v971_v41, %v888_v27  ;;  %v973_v43 = vpop.f32.mrb[21].mxu0  ;;  %1156 = vmatmul.mubr.bf16.vlgmr.msra.gmra.mrb[12].mxu1 %v984_v39 }
 0x5b5   :  { %v983_v44 = vmul.f32 %v973_v43, %v890_v30  ;;  %v975_v45 = vpop.f32.mrb[22].mxu0 }
 0x5b6   :  { %v976_v46 = vpop.f32.mrb[23].mxu0  ;;  %v986_v48 = vpack.c.bf16 %v982_v42, %v982_v42 }
 0x5b7   :  { %v987_v47 = vpack.c.bf16 %v983_v44, %v983_v44 }
 0x5b9   :  { %1163 = vmatprep.mubr.bf16.mxu1 %v987_v47 }
 0x5bc   :  { %1164 = vmatmul.mubr.bf16.gmra.mrb[16].mxu1 %v986_v48 }
 0x687   :  { %v1511_v63 = vpop.f32.mrb[12].mxu1 }
 0x688   :  { %v1512_v1 = vpop.f32.mrb[13].mxu1 }
 0x689   :  { %v1513_v4 = vadd.f32 %v1512_v1, %v1511_v63  ;;  %v1514_v5 = vpop.f32.mrb[14].mxu1  ;;  %v380_v63 = vsel %vm379_vm1, %v2550_v54, 0.0 }
 0x68a   :  { %v1515_v8 = vpop.f32.mrb[15].mxu1 }
 0x68b   :  { %v2603_v9 = vadd.f32 %v1513_v4, %v1447_v0  ;;  %v1516_v10 = vadd.f32 %v1515_v8, %v1514_v5 }
 0x68d   :  { %v2605_v13 = vadd.f32 %v1516_v10, %v1447_v0  ;;  %v1238_v14 = vsub.f32 %v2603_v9, %v1235_v6  ;;  %v1190_v15 = vsub.f32 %v2603_v9, %v1187_v7 }
 0x68f   :  { %v1517_v17 = vpop.f32.mrb[16].mxu1  ;;  %1241 = vmax.xlane.f32.xlu0 %v1238_v14  ;;  %1193 = vmax.xlane.f32.xlu1 %v1190_v15  ;;  %v1191_v22 = vsub.f32 %v2605_v13, %v1188_v11  ;;  %v1239_v23 = vsub.f32 %v2605_v13, %v1236_v16 }
 0x690   :  { %v1518_v18 = vpop.f32.mrb[17].mxu1 }
 0x691   :  { %v1519_v20 = vadd.f32 %v1518_v18, %v1517_v17  ;;  %v1520_v21 = vpop.f32.mrb[18].mxu1 }
 0x692   :  { %v1521_v25 = vpop.f32.mrb[19].mxu1 }
 0x693   :  { %v2613_v26 = vadd.f32 %v1519_v20, %v1447_v0  ;;  %1195 = vmax.xlane.f32.xlu0 %v1191_v22  ;;  %1243 = vmax.xlane.f32.xlu1 %v1239_v23  ;;  %v383_v0 = vsel %vm379_vm1, %v2548_v53, 0.0 }
 0x695   :  { %v1192_v27 = vsub.f32 %v2613_v26, %v1189_v19  ;;  %v1240_v28 = vsub.f32 %v2613_v26, %v1237_v24 }
 0x697   :  { %1197 = vmax.xlane.f32.xlu0 %v1192_v27  ;;  %1245 = vmax.xlane.f32.xlu1 %v1240_v28 }
 0x69b   :  { %1299 = vmax.xlane.f32.xlu0 %v2603_v9  ;;  %1301 = vmax.xlane.f32.xlu1 %v2605_v13 }
 0x71c   :  { %v1242_v29 = vpop.xlane.xlu0 %1241  ;;  %v1194_v30 = vpop.xlane.xlu1 %1193 }
 0x71d   :  { %v2619_v31 = vsub.f32 %v1190_v15, %v1194_v30  ;;  %v2621_v32 = vsub.f32 %v1238_v14, %v1242_v29 }
 0x71f   :  { %v1202_v33 = vmul.f32 1.442695, %v2619_v31  ;;  %v1250_v38 = vmul.f32 1.442695, %v2621_v32 }
 0x720   :  { %v1196_v34 = vpop.xlane.xlu0 %1195  ;;  %v1244_v35 = vpop.xlane.xlu1 %1243 }
 0x721   :  { %v2624_v36 = vsub.f32 %v1191_v22, %v1196_v34  ;;  %v2626_v37 = vsub.f32 %v1239_v23, %v1244_v35  ;;  %1655 = vpow2.f32 %v1202_v33 }
 0x723   :  { %v1204_v39 = vmul.f32 1.442695, %v2624_v36  ;;  %v1252_v40 = vmul.f32 1.442695, %v2626_v37 }
 0x724   :  { %v1198_v41 = vpop.xlane.xlu0 %1197  ;;  %v1246_v49 = vpop.xlane.xlu1 %1245 }
 0x725   :  { %1657 = vpow2.f32 %v1204_v39  ;;  %v2631_v42 = vsub.f32 %v1192_v27, %v1198_v41  ;;  %v2637_v57 = vsub.f32 %v1240_v28, %v1246_v49 }
 0x726   :  { %1659 = vpow2.f32 %v1250_v38 }
 0x727   :  { %v1206_v43 = vmul.f32 1.442695, %v2631_v42  ;;  %1661 = vpow2.f32 %v1252_v40  ;;  %v1254_v59 = vmul.f32 1.442695, %v2637_v57  ;;  %v1347_v40 = vsub.f32 1.0, %v2583_v52 }
 0x728   :  { %v1300_v1 = vpop.xlane.xlu0 %1299  ;;  %v1302_v2 = vpop.xlane.xlu1 %1301 }
 0x729   :  { %1663 = vpow2.f32 %v1206_v43  ;;  %vm1324_vm3 = vcmp.ge.f32.partialorder %v2605_v13, %v1302_v2  ;;  %vm1323_vm6 = vcmp.ge.f32.partialorder %v2603_v9, %v1300_v1 }
 0x72a   :  { %1665 = vpow2.f32 %v1254_v59 }
 0x72b   :  { %v1656_v44 = vpop.eup %1655 }
 0x72c   :  { %1208 = vadd.xlane.f32.xlu0 %v1656_v44 }
 0x72f   :  { %v1658_v45 = vpop.eup %1657 }
 0x730   :  { %v1660_v46 = vpop.eup %1659  ;;  %1210 = vadd.xlane.f32.xlu1 %v1658_v45 }
 0x731   :  { %1256 = vadd.xlane.f32.xlu0 %v1660_v46  ;;  %v1662_v47 = vpop.eup %1661 }
 0x733   :  { %v1664_v48 = vpop.eup %1663 }
 0x734   :  { %1258 = vadd.xlane.f32.xlu1 %v1662_v47  ;;  %v1666_v60 = vpop.eup %1665 }
 0x735   :  { %1212 = vadd.xlane.f32.xlu0 %v1664_v48 }
 0x739   :  { %1303 = vmax.xlane.f32.xlu0 %v2613_v26 }
 0x745   :  { %1307 = vperm.xlu1 %1593, %v2603_v9  }
 0x74f   :  { %1312 = vperm.xlu0 %1594, %v2605_v13  }
 0x769   :  { %1260 = vadd.xlane.f32.xlu1 %v1666_v60 }
 0x77a   :  { %1317 = vperm.xlu1 %1593, %v2613_v26  }
 0x79e   :  { %381 = vadd.xlane.f32.xlu1 %v380_v63 }
 0x7a2   :  { %384 = vadd.xlane.f32.xlu1 %v383_v0 }
 0x7b9   :  { %v1209_v3 = vpop.xlane.xlu0 %1208 }
 0x7ba   :  { %1667 = vlog2.f32 %v1209_v3 }
 0x7bd   :  { %v1211_v4 = vpop.xlane.xlu1 %1210 }
 0x7be   :  { %v1257_v5 = vpop.xlane.xlu0 %1256  ;;  %1669 = vlog2.f32 %v1211_v4 }
 0x7bf   :  { %1671 = vlog2.f32 %v1257_v5 }
 0x7c1   :  { %v1259_v6 = vpop.xlane.xlu1 %1258 }
 0x7c2   :  { %v1213_v7 = vpop.xlane.xlu0 %1212  ;;  %1673 = vlog2.f32 %v1259_v6 }
 0x7c3   :  { %1675 = vlog2.f32 %v1213_v7 }
 0x7c4   :  { %v1668_v8 = vpop.eup %1667 }
 0x7c5   :  { %v1215_v10 = vmul.f32 0.6931472, %v1668_v8 }
 0x7c6   :  { %v1304_v15 = vpop.xlane.xlu0 %1303 }
 0x7c7   :  { %v1220_v11 = vsub.f32 %v2619_v31, %v1215_v10  ;;  %vm1325_vm9 = vcmp.ge.f32.partialorder %v2613_v26, %v1304_v15 }
 0x7c8   :  { %v1670_v54 = vpop.eup %1669 }
 0x7c9   :  { %v1672_v12 = vpop.eup %1671  ;;  %v1217_v53 = vmul.f32 0.6931472, %v1670_v54  ;;  %v1223_v16 = vmul.f32 %v1220_v11, %v2590_v56  ;;  %v386_v56 = vsel %vm379_vm1, %v2556_v61, 0.0 }
 0x7ca   :  { %v1263_v14 = vmul.f32 0.6931472, %v1672_v12 }
 0x7cb   :  { %v1221_v17 = vsub.f32 %v2624_v36, %v1217_v53  ;;  %1226 = vadd.xlane.f32.xlu1 %v1223_v16 }
 0x7cc   :  { %v1674_v18 = vpop.eup %1673  ;;  %v1268_v19 = vsub.f32 %v2621_v32, %v1263_v14  ;;  %v1308_v32 = vpop.permute.xlu1 %1307 }
 0x7cd   :  { %v1676_v20 = vpop.eup %1675  ;;  %v1265_v21 = vmul.f32 0.6931472, %v1674_v18  ;;  %v1224_v22 = vmul.f32 %v1221_v17, %v2594_v58  ;;  %v2170_v58 = vmov 0.0   ;;  %vm1320_vm5 = vcmp.gt.f32.partialorder %v2603_v9, %v1308_v32 }
 0x7ce   :  { %v1219_v23 = vmul.f32 0.6931472, %v1676_v20  ;;  %v1313_v24 = vpop.permute.xlu0 %1312  ;;  %v1271_v25 = vmul.f32 %v1268_v19, %v2588_v55  ;;  %vm1326_vm7 = vmand %vm1320_vm5, %vm1323_vm6  ;;  %v1352_v9 = vrot.slane %v1347_v40, %v1178_v51 }
 0x7cf   :  { %1228 = vadd.xlane.f32.xlu0 %v1224_v22  ;;  %v1269_v27 = vsub.f32 %v2626_v37, %v1265_v21  ;;  %vm1321_vm2 = vcmp.gt.f32.partialorder %v2605_v13, %v1313_v24 }
 0x7d0   :  { %1274 = vadd.xlane.f32.xlu1 %v1271_v25  ;;  %v1222_v29 = vsub.f32 %v2631_v42, %v1219_v23  ;;  %vm1327_vm4 = vmand %vm1321_vm2, %vm1324_vm3 }
 0x7d1   :  { %v1272_v28 = vmul.f32 %v1269_v27, %v2588_v55  ;;  %v1330_v30 = vsel %vm1327_vm4, 1.0, %v2170_v58 }
 0x7d2   :  { %v1225_v31 = vmul.f32 %v1222_v29, %v2598_v62  ;;  %v1329_v62 = vsel %vm1326_vm7, 1.0, %v2170_v58  ;;  %v1355_v43 = vmul.f32 %v1352_v9, %v1330_v30 }
 0x7d3   :  { %387 = vadd.xlane.f32.xlu0 %v386_v56  ;;  %v1354_v53 = vmul.f32 %v1352_v9, %v1329_v62 }
 0x7d4   :  { %1276 = vadd.xlane.f32.xlu1 %v1272_v28 }
 0x7d7   :  { %1334 = vadd.xlane.f32.xlu0 %v1330_v30 }
 0x7d8   :  { %1230 = vadd.xlane.f32.xlu1 %v1225_v31 }
 0x7f6   :  { %v1261_v33 = vpop.xlane.xlu1 %1260 }
 0x7f7   :  { %1677 = vlog2.f32 %v1261_v33 }
 0x7fa   :  { %v1318_v13 = vpop.permute.xlu1 %1317 }
 0x7fb   :  { %vm1322_vm8 = vcmp.gt.f32.partialorder %v2613_v26, %v1318_v13 }
 0x7fc   :  { %vm1328_vm10 = vmand %vm1322_vm8, %vm1325_vm9 }
 0x7fd   :  { %v1331_v37 = vsel %vm1328_vm10, 1.0, %v2170_v58 }
 0x7fe   :  { %v1356_v20 = vmul.f32 %v1352_v9, %v1331_v37 }
 0x801   :  { %v1678_v61 = vpop.eup %1677 }
 0x802   :  { %v1267_v34 = vmul.f32 0.6931472, %v1678_v61 }
 0x804   :  { %v1270_v35 = vsub.f32 %v2637_v57, %v1267_v34 }
 0x806   :  { %v1273_v36 = vmul.f32 %v1270_v35, %v2588_v55 }
 0x808   :  { %1278 = vadd.xlane.f32.xlu1 %v1273_v36 }
 0x80c   :  { %1332 = vadd.xlane.f32.xlu1 %v1329_v62 }
 0x810   :  { %1336 = vadd.xlane.f32.xlu1 %v1331_v37 }
 0x82b   :  { %v382_v45 = vpop.xlane.xlu1 %381 }
 0x82c   :  { %vm389_vm13 = vcmp.gt.f32.partialorder %v382_v45, 0.0 }
 0x82d   :  { %v1406_v1 = vsel %vm389_vm13, 1.0, %v2170_v58 }
 0x82f   :  { %v385_v46 = vpop.xlane.xlu1 %384 }
 0x830   :  { %vm390_vm12 = vcmp.gt.f32.partialorder %v385_v46, 0.0 }
 0x831   :  { %v1407_v63 = vsel %vm390_vm12, 1.0, %v2170_v58 }
 0x858   :  { %v1227_v47 = vpop.xlane.xlu1 %1226 }
 0x859   :  { %v1232_v50 = vsub.f32 0.0, %v1227_v47 }
 0x85c   :  { %v1229_v38 = vpop.xlane.xlu0 %1228 }
 0x85d   :  { %v1275_v48 = vpop.xlane.xlu1 %1274  ;;  %v1233_v52 = vsub.f32 0.0, %v1229_v38 }
 0x85e   :  { %v1280_v59 = vsub.f32 0.0, %v1275_v48 }
 0x860   :  { %v388_v39 = vpop.xlane.xlu0 %387  ;;  %v1283_v0 = vadd.f32 %v1280_v59, %v1232_v50 }
 0x861   :  { %v1277_v49 = vpop.xlane.xlu1 %1276  ;;  %vm391_vm14 = vcmp.gt.f32.partialorder %v388_v39, 0.0 }
 0x862   :  { %v1281_v57 = vsub.f32 0.0, %v1277_v49  ;;  %v1408_v6 = vsel %vm391_vm14, 1.0, %v2170_v58  ;;  %v1286_v7 = vmul.f32 %v1406_v1, %v1283_v0 }
 0x864   :  { %v1335_v41 = vpop.xlane.xlu0 %1334  ;;  %v1284_v51 = vadd.f32 %v1281_v57, %v1233_v52 }
 0x865   :  { %vm1339_vm11 = vcmp.eq.f32.partialorder %v1335_v41, 0.0  ;;  %v1231_v60 = vpop.xlane.xlu1 %1230 }
 0x866   :  { %v1465_v42 = vsel %vm1339_vm11, 1.0, %v2170_v58  ;;  %v1287_v3 = vmul.f32 %v1407_v63, %v1284_v51  ;;  %v1234_v4 = vsub.f32 0.0, %v1231_v60 }
 0x867   :  { %v1358_v26 = vmul.f32 %v1465_v42, %v2588_v55 }
 0x868   :  { %v1289_v54 = vadd.f32 %v1287_v3, %v1286_v7 }
 0x869   :  { %v1361_v44 = vadd.f32 %v1358_v26, %v1355_v43 }
 0x86b   :  { %1364 = vst [vmem:[#allocation31 + $0x8] sm:$0xff] %v1361_v44 }
 0x895   :  { %v1279_v2 = vpop.xlane.xlu1 %1278 }
 0x896   :  { %v1282_v5 = vsub.f32 0.0, %v1279_v2 }
 0x898   :  { %v1285_v8 = vadd.f32 %v1282_v5, %v1234_v4 }
 0x899   :  { %v1333_v10 = vpop.xlane.xlu1 %1332 }
 0x89a   :  { %v1288_v11 = vmul.f32 %v1408_v6, %v1285_v8  ;;  %vm1338_vm15 = vcmp.eq.f32.partialorder %v1333_v10, 0.0 }
 0x89b   :  { %v1464_v12 = vsel %vm1338_vm15, 1.0, %v2170_v58 }
 0x89c   :  { %v1290_v14 = vadd.f32 %v1289_v54, %v1288_v11  ;;  %v1357_v15 = vmul.f32 %v1464_v12, %v2588_v55 }
 0x89d   :  { %v1337_v16 = vpop.xlane.xlu1 %1336 }
 0x89e   :  { %v1291_v17 = vrot.slane %v1290_v14, 4  ;;  %v1360_v18 = vadd.f32 %v1357_v15, %v1354_v53  ;;  %vm1340_vm0 = vcmp.eq.f32.partialorder %v1337_v16, 0.0 }
 0x89f   :  { %v1466_v19 = vsel %vm1340_vm0, 1.0, %v2170_v58 }
 0x8a0   :  { %1363 = vst [vmem:[#allocation31] sm:$0xff] %v1360_v18  ;;  %v1359_v21 = vmul.f32 %v1466_v19, %v2588_v55  ;;  %v1292_v22 = vadd.f32 %v1291_v17, %v1290_v14 }
 0x8a2   :  { %v1362_v23 = vadd.f32 %v1359_v21, %v1356_v20  ;;  %v1293_v24 = vrot.slane %v1292_v22, 2 }
 0x8a4   :  { %1365 = vst [vmem:[#allocation31 + $0x10] sm:$0xff] %v1362_v23  ;;  %v1294_v25 = vadd.f32 %v1293_v24, %v1292_v22 }
 0x8a5   :  { %2086 = shalt.err (!%p2083_p8)
}
 0x8a6   :  { %s2743_s6 = sld [smem:[#allocation50_spill]] }
 0x8ac   :  { %s2087_s11 = scalar_lea.hbm %s2743_s6, 384 }
 0x8ad   :  { %p2088_p9 = scmp.ne.s32.totalorder %s2743_s6, %s2087_s11  ;;  %p2091_p10 = scmp.lt.u32.totalorder %s2087_s11, %s2743_s6 }
 0x8af   :  { %p2093_p11 = pnand %p2091_p10, %p2088_p9 }
 0x8b1   :  { %2096 = shalt.err (!%p2093_p11)
}
 0x8b2   :  { %1377 = dma.vmem_to_hbm [thread:$0]  %s1372_s13, 384, %s2743_s6, [#allocation4], %s2154_s24, %s2154_s24, %s2155_s3   ;;  %v1295_v55 = vrot.slane %v1294_v25, 1 }
 0x8b3   :  { %s2097_s1 = scalar_lea.vmem %s1385_s19, 128  ;;  %p2102_p13 = scmp.lt.s32.totalorder %s1385_s19, %s1385_s19 }
 0x8b4   :  { %v1296_v27 = vadd.f32 %v1295_v55, %v1294_v25  ;;  %p2098_p12 = scmp.ne.s32.totalorder %s1385_s19, %s2097_s1  ;;  %p2103_p0 = scmp.lt.s32.totalorder %s2097_s1, %s2097_s1 }
 0x8b6   :  { %1298 = vst [vmem:[#allocation32] sm:$0xff] %v1296_v27  ;;  %p2104_p1 = por %p2103_p0, %p2102_p13 }
 0x8b8   :  { %p2105_p2 = pnand %p2104_p1, %p2098_p12 }
 0x8ba   :  { %2108 = shalt.err (!%p2105_p2)
}
 0x8bb   :  { %s2744_s2 = sld [smem:[#allocation51_spill]] }
 0x8c1   :  { %s2109_s25 = scalar_lea.hbm %s2744_s2, 128 }
 0x8c2   :  { %p2110_p3 = scmp.ne.s32.totalorder %s2744_s2, %s2109_s25  ;;  %p2113_p4 = scmp.lt.u32.totalorder %s2109_s25, %s2744_s2 }
 0x8c4   :  { %p2115_p5 = pnand %p2113_p4, %p2110_p3 }
 0x8c6   :  { %2118 = shalt.err (!%p2115_p5)
}
 0x8c7   :  { %1387 = dma.vmem_to_hbm [thread:$0]  %s1385_s19, 128, %s2744_s2, [#allocation33]  }
 0x8c8   :  { %2139 = dma.done.wait [#allocation4], 384  }
 0x8c9   :  { %2140 = vsyncadd [#allocation4], 4294966912 }
 0x8ca   :  { %2141 = dma.done.wait [#allocation33], 128  }
 0x8cb   :  { %2142 = vsyncadd [#allocation33], 4294967168 }
 0x8cc   :  { %1394 = vsyncpa [#allocation3], 1 }
 0x8cd   :  { %1395 = vsyncpa [#allocation6], 1 }
 0x8ce   :  { %1396 = vsyncpa [#allocation9], 1 }
 0x8cf   :  { %1397 = vsyncpa [#allocation12], 1 }
 0x8d0   :  { %1398 = vsyncpa [#allocation15], 1 }
 0x8d1   :  { %1399 = vsyncpa [#allocation18], 1 }
 0x8d2   :  { %1400 = vsyncpa [#allocation21], 1 }
 0x8d3   :  { %1401 = vsyncpa [#allocation24], 1 }
 0x8d4   :  { %1402 = vsyncpa [#allocation27], 1 }
 0x8d5   :  { %1403 = vsyncpa [#allocation30], 1 }
 0x8d6   :  { %1404 = vsyncpa [#allocation4], 1 }
 0x8d7   :  { %1405 = vsyncpa [#allocation33], 1 }

</bundles_post_ra>
